<compile_context>
chip_gen: v5e
topology: v5e:2x2
jax: 0.10.0
libtpu: 0.0.40
codegen_flags: <defaults>
</compile_context>

<pallas_src>
import jax
import jax.numpy as jnp
from jax.experimental import pallas as pl
from jax.experimental.pallas import tpu as pltpu

HID = 50    # logical hidden width (PyTorch Linear(1,50)/(50,50)/(50,1))
HPAD = 64   # hidden width zero-padded to a multiple of 8 sublanes (was 128)


def mlp_kernel(x_ref, pk_ref, w2_ref, o_ref):
    # x_ref: (1, TB) f32, batch on lanes.
    x = x_ref[...]

    # Packed skinny params: one lane-dense (HPAD, 8) f32 tile, columns:
    #   0: fc1.weight  1: fc1.bias  2: fc2.bias  3: fc3.weight  4(row 0): fc3.bias
    pk = pk_ref[...]
    w1 = pk[:, 0:1]        # (HPAD, 1)
    b1 = pk[:, 1:2]        # (HPAD, 1)
    b2 = pk[:, 2:3]        # (HPAD, 1)
    w3 = pk[:, 3:4]        # (HPAD, 1)
    b3 = pk[0:1, 4:5]      # (1, 1)

    # fc1 + ReLU: contraction dim K=1 -> VPU broadcast outer product, no MXU.
    h1 = jnp.maximum(w1 * x + b1, 0.0)                      # (HPAD, TB) f32

    # fc2 + ReLU: the only real matmul -> single bf16 MXU pass, f32 accumulate.
    h2 = jnp.dot(w2_ref[...], h1.astype(jnp.bfloat16),
                 preferred_element_type=jnp.float32) + b2    # (HPAD, TB) f32
    h2 = jnp.maximum(h2, 0.0)

    # fc3: output dim N=1 -> VPU multiply + sublane (XLU) reduction, no MXU.
    out = jnp.sum(h2 * w3, axis=0, keepdims=True) + b3       # (1, TB)

    o_ref[...] = out.astype(o_ref.dtype)                     # lane-dense store


def pad_params(p):
    """Zero-pad hidden 50 -> HPAD and pack params for the kernel.
    Returns (pk, w2): pk is (HPAD, 8) f32 with the skinny params as columns,
    w2 is (HPAD, HPAD) bf16 (fc2 weight). Zero padding is exact: padded h1/h2
    rows are relu(0 + 0) = 0 and padded w3 rows contribute 0 to the sum."""
    pk = jnp.zeros((HPAD, 8), jnp.float32)
    pk = pk.at[:HID, 0].set(p["w1"][:, 0].astype(jnp.float32))   # fc1.weight (50, 1)
    pk = pk.at[:HID, 1].set(p["b1"].astype(jnp.float32))         # fc1.bias   (50,)
    pk = pk.at[:HID, 2].set(p["b2"].astype(jnp.float32))         # fc2.bias   (50,)
    pk = pk.at[:HID, 3].set(p["w3"][0, :].astype(jnp.float32))   # fc3.weight (1, 50)
    pk = pk.at[0, 4].set(p["b3"][0].astype(jnp.float32))         # fc3.bias   (1,)

    w2 = jnp.zeros((HPAD, HPAD), jnp.float32)
    w2 = w2.at[:HID, :HID].set(p["w2"].astype(jnp.float32))      # fc2.weight (50, 50)
    return pk, w2.astype(jnp.bfloat16)


def neural_network_forward(x, params, *, tb=2048):
    """x: (B, 1) float32. params: PyTorch-layout weights (see init_params).
    tb: batch tile (lane width per grid step); sweep 2048-8192 for large B.
    For best v7x megacore use, pick tb so the padded batch gives >= 2 steps."""
    B = x.shape[0]
    pk, w2 = pad_params(params)

    bp = pl.cdiv(B, tb) * tb
    # Batch on the lane axis, zero-padded to a multiple of the batch tile.
    x_row = jnp.pad(x[:, 0].astype(jnp.float32), (0, bp - B)).reshape(1, bp)

    # Rough per-step VMEM need (h1/h2 f32 + bf16 copy + MXU result + I/O);
    # keep v5e's scoped limit sufficient without overshooting v7x's 64 MiB.
    vmem_bytes = min(48 * 1024 * 1024, max(16 * 1024 * 1024, 10 * HPAD * tb * 4))

    out_row = pl.pallas_call(
        mlp_kernel,
        out_shape=jax.ShapeDtypeStruct((1, bp), jnp.float32),
        grid=(bp // tb,),
        in_specs=[
            pl.BlockSpec((1, tb), lambda i: (0, i)),        # x tile (lane-dense)
            pl.BlockSpec((HPAD, 8), lambda i: (0, 0)),      # packed skinny params
            pl.BlockSpec((HPAD, HPAD), lambda i: (0, 0)),   # fc2 weight (bf16)
        ],
        out_specs=pl.BlockSpec((1, tb), lambda i: (0, i)),
        compiler_params=pltpu.CompilerParams(
            dimension_semantics=("parallel",),
            vmem_limit_bytes=vmem_bytes),
    )(x_row, pk, w2)

    return out_row.reshape(bp, 1)[:B]   # back to (B, 1)


def init_params(key):
    """PyTorch-layout parameters: weight (out, in), bias (out,).
    Mimics nn.Linear default init U(-1/sqrt(fan_in), 1/sqrt(fan_in))."""
    ks = jax.random.split(key, 6)

    def lin(kw, kb, fan_in, fan_out):
        bound = 1.0 / jnp.sqrt(jnp.float32(fan_in))
        w = jax.random.uniform(kw, (fan_out, fan_in), jnp.float32, -bound, bound)
        b = jax.random.uniform(kb, (fan_out,), jnp.float32, -bound, bound)
        return w, b

    w1, b1 = lin(ks[0], ks[1], 1, HID)
    w2, b2 = lin(ks[2], ks[3], HID, HID)
    w3, b3 = lin(ks[4], ks[5], HID, 1)
    return {"w1": w1, "b1": b1, "w2": w2, "b2": b2, "w3": w3, "b3": b3}


def reference_forward_f32(x, p):
    h1 = jnp.maximum(x @ p["w1"].T + p["b1"], 0.0)
    h2 = jnp.maximum(h1 @ p["w2"].T + p["b2"], 0.0)
    return h2 @ p["w3"].T + p["b3"]


def reference_forward_bf16_fc2(x, p):
    """Matches the kernel's numerics: fc2 operands in bf16, f32 accumulation."""
    h1 = jnp.maximum(x @ p["w1"].T + p["b1"], 0.0)
    h2 = jnp.dot(h1.astype(jnp.bfloat16), p["w2"].T.astype(jnp.bfloat16),
                 preferred_element_type=jnp.float32) + p["b2"]
    h2 = jnp.maximum(h2, 0.0)
    return h2 @ p["w3"].T + p["b3"]


if __name__ == "__main__":
    key = jax.random.PRNGKey(0)
    kp, kx = jax.random.split(key)
    params = init_params(kp)

    batch = 300   # deliberately not a multiple of the batch tile -> exercises padding
    x = jax.random.normal(kx, (batch, 1), jnp.float32)

    out = neural_network_forward(x, params, tb=2048)
    out = jax.block_until_ready(out)
    assert out.shape == (batch, 1)

    # Tight check against a reference with identical fc2 numerics (bf16 MXU pass).
    ref_bf16 = reference_forward_bf16_fc2(x, params)
    err = float(jnp.max(jnp.abs(out - ref_bf16)))
    assert jnp.allclose(out, ref_bf16, atol=2e-3, rtol=2e-3), err

    # Loose sanity check against the pure-f32 PyTorch-equivalent forward.
    ref_f32 = reference_forward_f32(x, params)
    err32 = float(jnp.max(jnp.abs(out - ref_f32)))
    assert jnp.allclose(out, ref_f32, atol=5e-2, rtol=5e-2), err32

    print("KERNEL_OK")
</pallas_src>

<mosaic_0001>
module attributes {stable_mosaic.version = 11 : i64} {
  func.func @mlp_kernel(%arg0: i32, %arg1: memref<1x2048xf32, #tpu.memory_space<vmem>>, %arg2: memref<64x8xf32, #tpu.memory_space<vmem>>, %arg3: memref<64x64xbf16, #tpu.memory_space<vmem>>, %arg4: memref<1x2048xf32, #tpu.memory_space<vmem>>) attributes {dimension_semantics = [#tpu.dimension_semantics<parallel>], iteration_bounds = array<i64: 1>, scalar_prefetch = 0 : i64, scratch_operands = 0 : i64, tpu.core_type = #tpu.core_type<tc>, window_params = [{transform_indices = @transform_0, window_bounds = array<i64: 1, 2048>}, {pipeline_mode = #tpu.pipeline_mode<synchronous>, transform_indices = @transform_1, window_bounds = array<i64: 64, 8>}, {pipeline_mode = #tpu.pipeline_mode<synchronous>, transform_indices = @transform_2, window_bounds = array<i64: 64, 64>}, {transform_indices = @transform_3, window_bounds = array<i64: 1, 2048>}]} {
    %c0 = arith.constant 0 : index
    %c0_0 = arith.constant 0 : index
    %0 = vector.load %arg1[%c0, %c0_0] : memref<1x2048xf32, #tpu.memory_space<vmem>>, vector<1x2048xf32>
    %c0_1 = arith.constant 0 : index
    %c0_2 = arith.constant 0 : index
    %1 = vector.load %arg2[%c0_1, %c0_2] : memref<64x8xf32, #tpu.memory_space<vmem>>, vector<64x8xf32>
    %2 = vector.extract_strided_slice %1 {offsets = [0, 0], sizes = [64, 1], strides = [1, 1]} : vector<64x8xf32> to vector<64x1xf32>
    %3 = vector.extract_strided_slice %1 {offsets = [0, 1], sizes = [64, 1], strides = [1, 1]} : vector<64x8xf32> to vector<64x1xf32>
    %4 = vector.extract_strided_slice %1 {offsets = [0, 2], sizes = [64, 1], strides = [1, 1]} : vector<64x8xf32> to vector<64x1xf32>
    %5 = vector.extract_strided_slice %1 {offsets = [0, 3], sizes = [64, 1], strides = [1, 1]} : vector<64x8xf32> to vector<64x1xf32>
    %6 = vector.extract_strided_slice %1 {offsets = [0, 4], sizes = [1, 1], strides = [1, 1]} : vector<64x8xf32> to vector<1x1xf32>
    %7 = vector.broadcast %2 : vector<64x1xf32> to vector<64x2048xf32>
    %8 = vector.broadcast %0 : vector<1x2048xf32> to vector<64x2048xf32>
    %9 = arith.mulf %7, %8 : vector<64x2048xf32>
    %10 = vector.broadcast %3 : vector<64x1xf32> to vector<64x2048xf32>
    %11 = arith.addf %9, %10 : vector<64x2048xf32>
    %cst = arith.constant 0.000000e+00 : f32
    %12 = vector.broadcast %cst : f32 to vector<64x2048xf32>
    %13 = arith.maximumf %11, %12 : vector<64x2048xf32>
    %c0_3 = arith.constant 0 : index
    %c0_4 = arith.constant 0 : index
    %14 = vector.load %arg3[%c0_3, %c0_4] : memref<64x64xbf16, #tpu.memory_space<vmem>>, vector<64x64xbf16>
    %15 = arith.truncf %13 : vector<64x2048xf32> to vector<64x2048xbf16>
    %cst_5 = arith.constant dense<0.000000e+00> : vector<64x2048xf32>
    %16 = tpu.matmul %14, %15, %cst_5 {dimension_numbers = #tpu.dot_dimension_numbers<[1], [0], [0], [1], [0, 0, 1, 1], [], []>} : vector<64x64xbf16>, vector<64x2048xbf16>, vector<64x2048xf32> -> vector<64x2048xf32>
    %17 = vector.broadcast %4 : vector<64x1xf32> to vector<64x2048xf32>
    %18 = arith.addf %16, %17 : vector<64x2048xf32>
    %cst_6 = arith.constant 0.000000e+00 : f32
    %19 = vector.broadcast %cst_6 : f32 to vector<64x2048xf32>
    %20 = arith.maximumf %18, %19 : vector<64x2048xf32>
    %21 = vector.broadcast %5 : vector<64x1xf32> to vector<64x2048xf32>
    %22 = arith.mulf %20, %21 : vector<64x2048xf32>
    %cst_7 = arith.constant dense<0.000000e+00> : vector<2048xf32>
    %23 = vector.multi_reduction <add>, %22, %cst_7 [0] : vector<64x2048xf32> to vector<2048xf32>
    %24 = vector.shape_cast %23 : vector<2048xf32> to vector<1x2048xf32>
    %25 = vector.broadcast %6 : vector<1x1xf32> to vector<1x2048xf32>
    %26 = arith.addf %24, %25 : vector<1x2048xf32>
    %c0_8 = arith.constant 0 : index
    %c0_9 = arith.constant 0 : index
    %27 = vector.load %arg4[%c0_8, %c0_9] : memref<1x2048xf32, #tpu.memory_space<vmem>>, vector<1x2048xf32>
    tpu.vector_store %arg4[%c0_8, %c0_9], %26 {strides = array<i32>} : memref<1x2048xf32, #tpu.memory_space<vmem>>, vector<1x2048xf32>,
    return
  }
  func.func @transform_0(%arg0: i32) -> (i32, i32) {
    %c0_i32 = arith.constant 0 : i32
    %c0_i32_0 = arith.constant 0 : i32
    return %c0_i32, %arg0 : i32, i32
  }
  func.func @transform_1(%arg0: i32) -> (i32, i32) {
    %c0_i32 = arith.constant 0 : i32
    %c0_i32_0 = arith.constant 0 : i32
    %c0_i32_1 = arith.constant 0 : i32
    return %c0_i32, %c0_i32_0 : i32, i32
  }
  func.func @transform_2(%arg0: i32) -> (i32, i32) {
    %c0_i32 = arith.constant 0 : i32
    %c0_i32_0 = arith.constant 0 : i32
    %c0_i32_1 = arith.constant 0 : i32
    return %c0_i32, %c0_i32_0 : i32, i32
  }
  func.func @transform_3(%arg0: i32) -> (i32, i32) {
    %c0_i32 = arith.constant 0 : i32
    %c0_i32_0 = arith.constant 0 : i32
    return %c0_i32, %arg0 : i32, i32
  }
}

</mosaic_0001>

<bundles_post_ra>
// kernel: tpu_custom_call.1
= control target key start
LH: loop header
LB: loop body
LE: loop exit
PB: predicated region body
PF: predicated region fallthrough
CT: control target
= control target key end

     0   :  { %v1842_v1 = vmov 1   ;;  %v1843_v2 = vmov 0   ;;  %s3134_s0 = inlined_call_operand.vmem [shape: f32[1,2048], index: 0, kind: input, shape index: {}]   ;;  %s3135_s1 = inlined_call_operand.vmem [shape: f32[64,8], index: 1, kind: input, shape index: {}]   ;;  %s3136_s2 = inlined_call_operand.vmem [shape: bf16[64,64], index: 2, kind: input, shape index: {}]   ;;  %s3137_s3 = inlined_call_operand.hbm [shape: f32[1,2048], index: 3, kind: output, shape index: {}]  }
   0x1   :  { %v1871_v0 = vld [vmem:[%s3135_s1 + $0x30] sm:$0xff]  ;;  %1795 = vset.pattern.permute.xlu1 %v1842_v1  ;;  %1794 = vset.pattern.permute.xlu0 %v1843_v2  ;;  %v1876_v3 = vld [vmem:[%s3135_s1 + $0x20] sm:$0xff] }
   0x2   :  { %3166 = vst [vmem:[#allocation5_spill] sm:$0xff] %v1871_v0  ;;  %253 = vperm.xlu1 %1795, %v1871_v0   ;;  %58 = vperm.xlu0 %1794, %v1871_v0  }
   0x3   :  { %3167 = vst [vmem:[#allocation6_spill] sm:$0xff] %v1876_v3 }
   0x4   :  { %8 = vsyncpa [#allocation3], 0  ;;  %1796 = vset.pattern.permute.xlu2 %v1843_v2  ;;  %v1884_v4 = vld [vmem:[%s3135_s1 + $0x38] sm:$0xff]  ;;  %v1889_v5 = vld [vmem:[%s3135_s1 + $0x28] sm:$0xff]  ;;  %vm640_vm0 = vcmask 523264   ;;  %vm1663_vm1 = vcmask 1040384  }
   0x5   :  { %48 = vperm.xlu2 %1796, %v1876_v3   ;;  %3168 = vst [vmem:[#allocation7_spill] sm:$0xff] %v1884_v4  ;;  %v1897_v6 = vld [vmem:[%s3135_s1 + $0x10] sm:$0xff]  ;;  %v1905_v7 = vld [vmem:[%s3135_s1 + $0x18] sm:$0xff]  ;;  %v1913_v8 = vld [vmem:[%s3135_s1] sm:$0xff]  ;;  %vm1665_vm2 = vcmask 1042434   ;;  %vm1667_vm3 = vcmask 1041408  }
   0x6   :  { %3169 = vst [vmem:[#allocation8_spill] sm:$0xff] %v1889_v5  ;;  %v1920_v9 = vld [vmem:[%s3135_s1 + $0x8] sm:$0xff]  ;;  %v16_v12 = vld [vmem:[%s3134_s0] sm:$0xff]  ;;  %vm1669_vm4 = vcmask 1044484   ;;  %vm1671_vm5 = vcmask 1046534   ;;  %vm1673_vm6 = vcmask 1045508  }
   0x7   :  { %3170 = vst [vmem:[#allocation9_spill] sm:$0xff] %v1897_v6  ;;  %v1931_v13 = vperm.slane %v16_v12, 0  ;;  %v1933_v14 = vperm.slane %v16_v12, 1  ;;  %v1935_v15 = vperm.slane %v16_v12, 2  ;;  %v1939_v17 = vperm.slane %v16_v12, 3  ;;  %v2050_v55 = vld [vmem:[%s3134_s0 + $0x8] sm:$0xff] }
   0x8   :  { %3171 = vst [vmem:[#allocation10_spill] sm:$0xff] %v1905_v7  ;;  %v1941_v18 = vperm.slane %v16_v12, 4  ;;  %v1943_v19 = vperm.slane %v16_v12, 5  ;;  %v1945_v20 = vperm.slane %v16_v12, 6  ;;  %v1959_v24 = vperm.slane %v16_v12, 7  ;;  %s1695_s18 = sshll.u32 %s3137_s3, 4  ;;  %s1696_s18 = int_to_ptr.hbm [resolvable:$true] %s1695_s18 }
   0x9   :  { %3172 = vst [vmem:[#allocation11_spill] sm:$0xff] %v1913_v8  ;;  %vm1675_vm7 = vcmask 1043456  }
   0xa   :  { %257 = vperm.xlu1 %1795, %v1884_v4   ;;  %63 = vperm.xlu0 %1794, %v1884_v4   ;;  %3173 = vst [vmem:[#allocation12_spill] sm:$0xff] %v1920_v9 }
   0xb   :  { %3179 = vst [vmem:[#allocation18_spill] sm:$0xff] %v2050_v55 }
   0xd   :  { %53 = vperm.xlu2 %1796, %v1889_v5  }
  0x12   :  { %1797 = vset.pattern.permute.xlu0 %v1842_v1  ;;  %249 = vperm.xlu1 %1795, %v1889_v5  }
  0x13   :  { %245 = vperm.xlu0 %1797, %v1876_v3  }
  0x15   :  { %38 = vperm.xlu2 %1796, %v1897_v6  }
  0x1a   :  { %1798 = vset.pattern.permute.xlu1 %v1843_v2 }
  0x1b   :  { %241 = vperm.xlu0 %1797, %v1905_v7   ;;  %43 = vperm.xlu1 %1798, %v1905_v7  }
  0x1d   :  { %1799 = vset.pattern.permute.xlu2 %v1842_v1 }
  0x1e   :  { %237 = vperm.xlu2 %1799, %v1897_v6  }
  0x23   :  { %229 = vperm.xlu0 %1797, %v1913_v8   ;;  %28 = vperm.xlu1 %1798, %v1913_v8  }
  0x26   :  { %1800 = vset.pattern.permute.xlu2 %v1843_v2 }
  0x27   :  { %33 = vperm.xlu2 %1800, %v1920_v9  }
  0x2b   :  { %1801 = vset.pattern.permute.xlu1 %v1842_v1 }
  0x2c   :  { %233 = vperm.xlu1 %1801, %v1920_v9  }
  0x5f   :  { %v1924_v10 = vpop.permute.xlu2 %48 }
  0x60   :  { %3174 = vst [vmem:[#allocation13_spill] sm:$0xff] %v1924_v10  ;;  %v1949_v21 = vmul.f32 %v1931_v13, %v1924_v10  ;;  %v1953_v22 = vmul.f32 %v1933_v14, %v1924_v10  ;;  %v1957_v23 = vmul.f32 %v1935_v15, %v1924_v10  ;;  %v1975_v28 = vmul.f32 %v1939_v17, %v1924_v10 }
  0x61   :  { %v1983_v30 = vmul.f32 %v1941_v18, %v1924_v10  ;;  %v1991_v32 = vmul.f32 %v1943_v19, %v1924_v10  ;;  %v1999_v34 = vmul.f32 %v1945_v20, %v1924_v10  ;;  %v2007_v36 = vmul.f32 %v1959_v24, %v1924_v10 }
  0x67   :  { %v1926_v11 = vpop.permute.xlu2 %53 }
  0x68   :  { %3175 = vst [vmem:[#allocation14_spill] sm:$0xff] %v1926_v11  ;;  %v1963_v25 = vmul.f32 %v1931_v13, %v1926_v11  ;;  %v1967_v26 = vmul.f32 %v1933_v14, %v1926_v11  ;;  %v1971_v27 = vmul.f32 %v1935_v15, %v1926_v11  ;;  %v1979_v29 = vmul.f32 %v1939_v17, %v1926_v11 }
  0x69   :  { %v1987_v31 = vmul.f32 %v1941_v18, %v1926_v11  ;;  %v1995_v33 = vmul.f32 %v1943_v19, %v1926_v11  ;;  %v2003_v35 = vmul.f32 %v1945_v20, %v1926_v11  ;;  %v2017_v40 = vmul.f32 %v1959_v24, %v1926_v11 }
  0x6f   :  { %v1937_v16 = vpop.permute.xlu2 %38 }
  0x70   :  { %3176 = vst [vmem:[#allocation15_spill] sm:$0xff] %v1937_v16  ;;  %v132_v37 = vmul.f32 %v1931_v13, %v1937_v16  ;;  %v133_v38 = vmul.f32 %v1933_v14, %v1937_v16  ;;  %v134_v39 = vmul.f32 %v1935_v15, %v1937_v16  ;;  %v135_v43 = vmul.f32 %v1939_v17, %v1937_v16 }
  0x71   :  { %v136_v44 = vmul.f32 %v1941_v18, %v1937_v16  ;;  %v137_v45 = vmul.f32 %v1943_v19, %v1937_v16  ;;  %v138_v46 = vmul.f32 %v1945_v20, %v1937_v16 }
  0x74   :  { %v2019_v41 = vpop.permute.xlu1 %253  ;;  %v2021_v42 = vpop.permute.xlu0 %58 }
  0x75   :  { %3177 = vst [vmem:[#allocation16_spill] sm:$0xff] %v2019_v41  ;;  %v196_v47 = vmul.f32 %v1931_v13, %v2021_v42  ;;  %v197_v48 = vmul.f32 %v1933_v14, %v2021_v42  ;;  %v198_v49 = vmul.f32 %v1935_v15, %v2021_v42  ;;  %v199_v50 = vmul.f32 %v1939_v17, %v2021_v42 }
  0x76   :  { %3178 = vst [vmem:[#allocation17_spill] sm:$0xff] %v2021_v42  ;;  %v200_v51 = vmul.f32 %v1941_v18, %v2021_v42  ;;  %v201_v52 = vmul.f32 %v1943_v19, %v2021_v42  ;;  %v202_v53 = vmul.f32 %v1945_v20, %v2021_v42  ;;  %v203_v54 = vmul.f32 %v1959_v24, %v2021_v42 }
  0x77   :  { %v356_v57 = vadd.f32 %v2019_v41, %v196_v47  ;;  %v357_v58 = vadd.f32 %v2019_v41, %v197_v48  ;;  %v358_v59 = vadd.f32 %v2019_v41, %v198_v49  ;;  %v359_v60 = vadd.f32 %v2019_v41, %v199_v50 }
  0x78   :  { %v2052_v56 = vpop.permute.xlu2 %237  ;;  %v2071_v48 = vperm.slane %v2050_v55, 0  ;;  %v2117_v50 = vmul.f32 %v1959_v24, %v1937_v16 }
  0x79   :  { %v2059_v61 = vadd.f32 %v2052_v56, %v132_v37  ;;  %v2062_v62 = vadd.f32 %v2052_v56, %v133_v38  ;;  %v2065_v63 = vadd.f32 %v2052_v56, %v134_v39  ;;  %v2068_v1 = vadd.f32 %v2052_v56, %v135_v43 }
  0x7a   :  { %v484_v2 = vmax.f32 %v356_v57, 0.0  ;;  %v485_v12 = vmax.f32 %v357_v58, 0.0  ;;  %v486_v47 = vmax.f32 %v358_v59, 0.0  ;;  %3180 = vst [vmem:[#allocation19_spill] sm:$0xff] %v2071_v48  ;;  %v487_v49 = vmax.f32 %v359_v60, 0.0 }
  0x7b   :  { %v2078_v39 = vadd.f32 %v2019_v41, %v200_v51  ;;  %v2081_v43 = vadd.f32 %v2019_v41, %v201_v52  ;;  %v2084_v57 = vadd.f32 %v2019_v41, %v202_v53  ;;  %v2091_v60 = vadd.f32 %v2019_v41, %v203_v54 }
  0x7c   :  { %v2086_v58 = vpop.permute.xlu1 %257  ;;  %v2088_v59 = vpop.permute.xlu0 %63  ;;  %v2094_v38 = vadd.f32 %v2052_v56, %v136_v44  ;;  %v2097_v4 = vadd.f32 %v2052_v56, %v137_v45  ;;  %v2100_v51 = vadd.f32 %v2052_v56, %v138_v46 }
  0x7d   :  { %v212_v52 = vmul.f32 %v1931_v13, %v2088_v59  ;;  %v213_v53 = vmul.f32 %v1933_v14, %v2088_v59  ;;  %v214_v37 = vmul.f32 %v1935_v15, %v2088_v59  ;;  %v215_v54 = vmul.f32 %v1939_v17, %v2088_v59 }
  0x7e   :  { %v216_v44 = vmul.f32 %v1941_v18, %v2088_v59  ;;  %v488_v45 = vmax.f32 %v2078_v39, 0.0  ;;  %v217_v46 = vmul.f32 %v1943_v19, %v2088_v59  ;;  %v489_v6 = vmax.f32 %v2081_v43, 0.0 }
  0x7f   :  { %v372_v5 = vadd.f32 %v2086_v58, %v212_v52  ;;  %v373_v0 = vadd.f32 %v2086_v58, %v213_v53  ;;  %v374_v7 = vadd.f32 %v2086_v58, %v214_v37  ;;  %v375_v3 = vadd.f32 %v2086_v58, %v215_v54 }
  0x80   :  { %v376_v11 = vadd.f32 %v2086_v58, %v216_v44  ;;  %v377_v39 = vadd.f32 %v2086_v58, %v217_v46  ;;  %v218_v16 = vmul.f32 %v1945_v20, %v2088_v59  ;;  %v490_v43 = vmax.f32 %v2084_v57, 0.0 }
  0x81   :  { %v2123_v8 = vpop.permute.xlu2 %33  ;;  %v500_v9 = vmax.f32 %v372_v5, 0.0  ;;  %v501_v10 = vmax.f32 %v373_v0, 0.0  ;;  %v502_v52 = vmax.f32 %v374_v7, 0.0  ;;  %v503_v41 = vmax.f32 %v375_v3, 0.0 }
  0x82   :  { %v2132_v37 = vmul.f32 %v1931_v13, %v2123_v8  ;;  %v2136_v53 = vmul.f32 %v1933_v14, %v2123_v8  ;;  %v2140_v54 = vmul.f32 %v1935_v15, %v2123_v8  ;;  %v2147_v3 = vmul.f32 %v1939_v17, %v2123_v8 }
  0x83   :  { %v572_v44 = vpack.c.bf16 %v500_v9, %v484_v2  ;;  %v573_v46 = vpack.c.bf16 %v501_v10, %v485_v12  ;;  %v574_v5 = vpack.c.bf16 %v502_v52, %v486_v47  ;;  %v575_v0 = vpack.c.bf16 %v503_v41, %v487_v49 }
  0x84   :  { %3181 = vst [vmem:[#allocation20_spill] sm:$0xff] %v2136_v53  ;;  %v2143_v7 = vpop.permute.xlu1 %249  ;;  %v504_v55 = vmax.f32 %v376_v11, 0.0  ;;  %v378_v48 = vadd.f32 %v2086_v58, %v218_v16  ;;  %v219_v42 = vmul.f32 %v1959_v24, %v2088_v59  ;;  %v505_v2 = vmax.f32 %v377_v39, 0.0 }
  0x85   :  { %v2152_v53 = vpop.permute.xlu0 %245  ;;  %657 = vmatpush.bf16.msra.mxu0 %v572_v44  ;;  %686 = vmatpush.bf16.msra.mxu1 %v573_v46  ;;  %v340_v9 = vadd.f32 %v2143_v7, %v1963_v25  ;;  %v341_v10 = vadd.f32 %v2143_v7, %v1967_v26  ;;  %v342_v41 = vadd.f32 %v2143_v7, %v1971_v27 }
  0x86   :  { %715 = vmatpush.bf16.msra.mxu2 %v574_v5  ;;  %744 = vmatpush.bf16.msra.mxu3 %v575_v0  ;;  %v324_v11 = vadd.f32 %v2152_v53, %v1949_v21  ;;  %v325_v16 = vadd.f32 %v2152_v53, %v1953_v22  ;;  %v326_v12 = vadd.f32 %v2152_v53, %v1957_v23  ;;  %v506_v47 = vmax.f32 %v378_v48, 0.0 }
  0x87   :  { %v468_v25 = vmax.f32 %v340_v9, 0.0  ;;  %v469_v49 = vmax.f32 %v341_v10, 0.0  ;;  %v470_v57 = vmax.f32 %v342_v41, 0.0  ;;  %v327_v26 = vadd.f32 %v2152_v53, %v1975_v28 }
  0x88   :  { %v452_v27 = vmax.f32 %v324_v11, 0.0  ;;  %v453_v39 = vmax.f32 %v325_v16, 0.0  ;;  %v454_v52 = vmax.f32 %v326_v12, 0.0  ;;  %v343_v44 = vadd.f32 %v2143_v7, %v1979_v29 }
  0x89   :  { %v455_v21 = vmax.f32 %v327_v26, 0.0  ;;  %v2170_v46 = vpack.c.bf16 %v504_v55, %v488_v45  ;;  %v2172_v22 = vpack.c.bf16 %v505_v2, %v489_v6  ;;  %v491_v23 = vmax.f32 %v2091_v60, 0.0 }
  0x8a   :  { %v556_v48 = vpack.c.bf16 %v468_v25, %v452_v27  ;;  %v557_v5 = vpack.c.bf16 %v469_v49, %v453_v39  ;;  %v558_v0 = vpack.c.bf16 %v470_v57, %v454_v52  ;;  %v471_v9 = vmax.f32 %v343_v44, 0.0 }
  0x8b   :  { %v2175_v10 = vpack.c.bf16 %v506_v47, %v490_v43  ;;  %v379_v28 = vadd.f32 %v2086_v58, %v219_v42  ;;  %v328_v41 = vadd.f32 %v2152_v53, %v1983_v30  ;;  %v344_v29 = vadd.f32 %v2143_v7, %v1987_v31 }
  0x8c   :  { %658 = vmatpush.bf16.msra.mxu0 %v556_v48  ;;  %687 = vmatpush.bf16.msra.mxu1 %v557_v5  ;;  %v559_v6 = vpack.c.bf16 %v471_v9, %v455_v21  ;;  %v329_v55 = vadd.f32 %v2152_v53, %v1991_v32  ;;  %v345_v60 = vadd.f32 %v2143_v7, %v1995_v33  ;;  %v424_v45 = vmax.f32 %v2094_v38, 0.0 }
  0x8d   :  { %716 = vmatpush.bf16.msra.mxu2 %v558_v0  ;;  %v2187_v43 = vpop.permute.xlu0 %241  ;;  %v2189_v42 = vpop.permute.xlu1 %43  ;;  %v507_v30 = vmax.f32 %v379_v28, 0.0  ;;  %v456_v2 = vmax.f32 %v328_v41, 0.0  ;;  %v472_v11 = vmax.f32 %v344_v29, 0.0  ;;  %v330_v31 = vadd.f32 %v2152_v53, %v1999_v34 }
  0x8e   :  { %745 = vmatpush.bf16.msra.mxu3 %v559_v6  ;;  %v148_v32 = vmul.f32 %v1931_v13, %v2189_v42  ;;  %v149_v33 = vmul.f32 %v1933_v14, %v2189_v42  ;;  %v150_v38 = vmul.f32 %v1935_v15, %v2189_v42  ;;  %v151_v16 = vmul.f32 %v1939_v17, %v2189_v42 }
  0x8f   :  { %v2201_v12 = vpack.c.bf16 %v507_v30, %v491_v23  ;;  %v2203_v47 = vpack.c.bf16 %v472_v11, %v456_v2  ;;  %v457_v25 = vmax.f32 %v329_v55, 0.0  ;;  %v473_v49 = vmax.f32 %v345_v60, 0.0 }
  0x90   :  { %v308_v34 = vadd.f32 %v2187_v43, %v148_v32  ;;  %v309_v57 = vadd.f32 %v2187_v43, %v149_v33  ;;  %v310_v26 = vadd.f32 %v2187_v43, %v150_v38  ;;  %v311_v27 = vadd.f32 %v2187_v43, %v151_v16 }
  0x91   :  { %v2209_v39 = vpack.c.bf16 %v473_v49, %v457_v25  ;;  %v346_v52 = vadd.f32 %v2143_v7, %v2003_v35  ;;  %v458_v44 = vmax.f32 %v330_v31, 0.0  ;;  %v331_v21 = vadd.f32 %v2152_v53, %v2007_v36 }
  0x92   :  { %v436_v23 = vmax.f32 %v308_v34, 0.0  ;;  %v437_v48 = vmax.f32 %v309_v57, 0.0  ;;  %v438_v5 = vmax.f32 %v310_v26, 0.0  ;;  %v439_v0 = vmax.f32 %v311_v27, 0.0 }
  0x93   :  { %v474_v9 = vmax.f32 %v346_v52, 0.0  ;;  %v347_v28 = vadd.f32 %v2143_v7, %v2017_v40  ;;  %v459_v41 = vmax.f32 %v331_v21, 0.0  ;;  %v152_v29 = vmul.f32 %v1941_v18, %v2189_v42 }
  0x94   :  { %v3182_v6 = vmax.f32 %v2059_v61, 0.0  ;;  %v3183_v35 = vmax.f32 %v2062_v62, 0.0  ;;  %v3184_v36 = vmax.f32 %v2065_v63, 0.0  ;;  %v3185_v2 = vmax.f32 %v2068_v1, 0.0 }
  0x95   :  { %v2227_v31 = vpop.permute.xlu1 %28  ;;  %v2229_v32 = vpack.c.bf16 %v474_v9, %v458_v44  ;;  %v475_v40 = vmax.f32 %v347_v28, 0.0  ;;  %v312_v33 = vadd.f32 %v2187_v43, %v152_v29  ;;  %v153_v61 = vmul.f32 %v1943_v19, %v2189_v42  ;;  %v2241_v16 = vpop.permute.xlu0 %229 }
  0x96   :  { %v540_v55 = vpack.c.bf16 %v436_v23, %v3182_v6  ;;  %v541_v60 = vpack.c.bf16 %v437_v48, %v3183_v35  ;;  %v542_v30 = vpack.c.bf16 %v438_v5, %v3184_v36  ;;  %v543_v11 = vpack.c.bf16 %v439_v0, %v3185_v2 }
  0x97   :  { %v100_v62 = vmul.f32 %v1931_v13, %v2227_v31  ;;  %v101_v63 = vmul.f32 %v1933_v14, %v2227_v31  ;;  %v102_v1 = vmul.f32 %v1935_v15, %v2227_v31  ;;  %v425_v38 = vmax.f32 %v2097_v4, 0.0 }
  0x98   :  { %659 = vmatpush.bf16.msra.mxu0 %v540_v55  ;;  %688 = vmatpush.bf16.msra.mxu1 %v541_v60  ;;  %v103_v25 = vmul.f32 %v1939_v17, %v2227_v31  ;;  %v2245_v49 = vpack.c.bf16 %v475_v40, %v459_v41  ;;  %v440_v34 = vmax.f32 %v312_v33, 0.0  ;;  %v313_v13 = vadd.f32 %v2187_v43, %v153_v61  ;;  %v3186_v40 = vld [vmem:[#allocation20_spill] sm:$0xff] }
  0x99   :  { %717 = vmatpush.bf16.msra.mxu2 %v542_v30  ;;  %746 = vmatpush.bf16.msra.mxu3 %v543_v11  ;;  %v260_v57 = vadd.f32 %v2241_v16, %v100_v62  ;;  %v261_v14 = vadd.f32 %v2241_v16, %v101_v63  ;;  %v262_v15 = vadd.f32 %v2241_v16, %v102_v1  ;;  %v426_v17 = vmax.f32 %v2100_v51, 0.0 }
  0x9a   :  { %v154_v4 = vmul.f32 %v1945_v20, %v2189_v42  ;;  %v263_v26 = vadd.f32 %v2241_v16, %v103_v25  ;;  %v2254_v27 = vpack.c.bf16 %v440_v34, %v424_v45  ;;  %v441_v52 = vmax.f32 %v313_v13, 0.0 }
  0x9b   :  { %v388_v44 = vmax.f32 %v260_v57, 0.0  ;;  %v389_v21 = vmax.f32 %v261_v14, 0.0  ;;  %v390_v23 = vmax.f32 %v262_v15, 0.0  ;;  %v155_v9 = vmul.f32 %v1959_v24, %v2189_v42 }
  0x9c   :  { %v314_v48 = vadd.f32 %v2187_v43, %v154_v4  ;;  %v391_v5 = vmax.f32 %v263_v26, 0.0  ;;  %v2258_v0 = vpack.c.bf16 %v441_v52, %v425_v38  ;;  %v299_v28 = vadd.f32 %v2052_v56, %v2117_v50 }
  0x9d   :  { %v104_v45 = vmul.f32 %v1941_v18, %v2227_v31  ;;  %v120_v51 = vmul.f32 %v1941_v18, %v2123_v8  ;;  %v105_v29 = vmul.f32 %v1943_v19, %v2227_v31  ;;  %v315_v6 = vadd.f32 %v2187_v43, %v155_v9 }
  0x9e   :  { %v442_v41 = vmax.f32 %v314_v48, 0.0  ;;  %v427_v55 = vmax.f32 %v299_v28, 0.0  ;;  %v121_v35 = vmul.f32 %v1943_v19, %v2123_v8  ;;  %v106_v60 = vmul.f32 %v1945_v20, %v2227_v31  ;;  %v2275_v50 = vpop.permute.xlu1 %233  ;;  %v2304_v28 = vld [vmem:[%s3136_s2] sm:$0xff] }
  0x9f   :  { %v264_v30 = vadd.f32 %v2241_v16, %v104_v45  ;;  %v265_v18 = vadd.f32 %v2241_v16, %v105_v29  ;;  %v122_v2 = vmul.f32 %v1945_v20, %v2123_v8  ;;  %v276_v11 = vadd.f32 %v2275_v50, %v2132_v37  ;;  %v3189_v45 = vld [vmem:[#allocation18_spill] sm:$0xff] }
  0xa0   :  { %v2277_v36 = vpack.c.bf16 %v442_v41, %v426_v17  ;;  %v277_v19 = vadd.f32 %v2275_v50, %v3186_v40  ;;  %v278_v33 = vadd.f32 %v2275_v50, %v2140_v54  ;;  %v279_v61 = vadd.f32 %v2275_v50, %v2147_v3 }
  0xa1   :  { %v443_v62 = vmax.f32 %v315_v6, 0.0  ;;  %v280_v63 = vadd.f32 %v2275_v50, %v120_v51  ;;  %v392_v1 = vmax.f32 %v264_v30, 0.0  ;;  %v281_v38 = vadd.f32 %v2275_v50, %v121_v35  ;;  %v3190_v30 = vld [vmem:[#allocation16_spill] sm:$0xff] }
  0xa2   :  { %v404_v25 = vmax.f32 %v276_v11, 0.0  ;;  %v405_v20 = vmax.f32 %v277_v19, 0.0  ;;  %v406_v34 = vmax.f32 %v278_v33, 0.0  ;;  %v407_v13 = vmax.f32 %v279_v61, 0.0 }
  0xa3   :  { %v2293_v37 = vpack.c.bf16 %v443_v62, %v427_v55  ;;  %v408_v57 = vmax.f32 %v280_v63, 0.0  ;;  %v393_v14 = vmax.f32 %v265_v18, 0.0  ;;  %v409_v15 = vmax.f32 %v281_v38, 0.0 }
  0xa4   :  { %v524_v4 = vpack.c.bf16 %v404_v25, %v388_v44  ;;  %v525_v54 = vpack.c.bf16 %v405_v20, %v389_v21  ;;  %v526_v26 = vpack.c.bf16 %v406_v34, %v390_v23  ;;  %v527_v52 = vpack.c.bf16 %v407_v13, %v391_v5  ;;  %v3187_v23 = vld [vmem:[#allocation17_spill] sm:$0xff]  ;;  %v3188_v5 = vld [vmem:[#allocation19_spill] sm:$0xff] }
  0xa5   :  { %v2295_v3 = vpack.c.bf16 %v408_v57, %v392_v1  ;;  %v2297_v17 = vpack.c.bf16 %v409_v15, %v393_v14  ;;  %v266_v48 = vadd.f32 %v2241_v16, %v106_v60  ;;  %v282_v9 = vadd.f32 %v2275_v50, %v122_v2 }
  0xa6   :  { %660 = vmatpush.bf16.msra.mxu0 %v524_v4  ;;  %689 = vmatpush.bf16.msra.mxu1 %v525_v54  ;;  %v107_v44 = vmul.f32 %v1959_v24, %v2227_v31  ;;  %v123_v21 = vmul.f32 %v1959_v24, %v2123_v8  ;;  %v204_v41 = vmul.f32 %v3188_v5, %v3187_v23  ;;  %v2313_v51 = vperm.slane %v3189_v45, 1 }
  0xa7   :  { %718 = vmatpush.bf16.msra.mxu2 %v526_v26  ;;  %747 = vmatpush.bf16.msra.mxu3 %v527_v52  ;;  %v394_v29 = vmax.f32 %v266_v48, 0.0  ;;  %v410_v6 = vmax.f32 %v282_v9, 0.0  ;;  %v220_v55 = vmul.f32 %v3188_v5, %v2088_v59  ;;  %v2318_v35 = vperm.slane %v3189_v45, 2  ;;  %v3192_v26 = vld [vmem:[#allocation12_spill] sm:$0xff]  ;;  %v3193_v52 = vld [vmem:[#allocation9_spill] sm:$0xff]  ;;  %v3194_v48 = vld [vmem:[#allocation14_spill] sm:$0xff] }
  0xa8   :  { %v267_v24 = vadd.f32 %v2241_v16, %v107_v44  ;;  %v283_v60 = vadd.f32 %v2275_v50, %v123_v21  ;;  %v364_v18 = vadd.f32 %v3190_v30, %v204_v41  ;;  %v2326_v2 = vperm.slane %v3189_v45, 3 }
  0xa9   :  { %v2330_v11 = vpack.c.bf16 %v410_v6, %v394_v29  ;;  %v380_v40 = vadd.f32 %v2086_v58, %v220_v55  ;;  %1720 = vmatmul.msk.bf16.vlgmr.msra.gmra.mxu0 %vm640_vm0, %v2304_v28  ;;  %1724 = vmatmul.msk.bf16.vlgmr.msra.gmra.mxu1 %vm640_vm0, %v2304_v28  ;;  %v206_v62 = vmul.f32 %v2318_v35, %v3187_v23  ;;  %v1844_v15 = vmov 2  }
  0xaa   :  { %773 = vmatpush.bf16.msrb.mxu0 %v2170_v46  ;;  %802 = vmatpush.bf16.msrb.mxu1 %v2172_v22  ;;  %v205_v46 = vmul.f32 %v2313_v51, %v3187_v23  ;;  %v395_v22 = vmax.f32 %v267_v24, 0.0  ;;  %v411_v19 = vmax.f32 %v283_v60, 0.0  ;;  %v492_v33 = vmax.f32 %v364_v18, 0.0 }
  0xab   :  { %831 = vmatpush.bf16.msrb.mxu2 %v2175_v10  ;;  %860 = vmatpush.bf16.msrb.mxu3 %v2201_v12  ;;  %v221_v10 = vmul.f32 %v2313_v51, %v2088_v59  ;;  %v508_v12 = vmax.f32 %v380_v40, 0.0  ;;  %v222_v63 = vmul.f32 %v2318_v35, %v2088_v59  ;;  %v207_v25 = vmul.f32 %v2326_v2, %v3187_v23 }
  0xac   :  { %1728 = vmatmul.msk.bf16.vlgmr.msra.gmra.mxu2 %vm640_vm0, %v2304_v28  ;;  %1732 = vmatmul.msk.bf16.vlgmr.msra.gmra.mxu3 %vm640_vm0, %v2304_v28  ;;  %v365_v61 = vadd.f32 %v3190_v30, %v205_v46  ;;  %v531_v1 = vpack.c.bf16 %v411_v19, %v395_v22  ;;  %v366_v13 = vadd.f32 %v3190_v30, %v206_v62  ;;  %v3195_v19 = vld [vmem:[#allocation11_spill] sm:$0xff] }
  0xad   :  { %v381_v38 = vadd.f32 %v2086_v58, %v221_v10  ;;  %v580_v20 = vpack.c.bf16 %v508_v12, %v492_v33  ;;  %v382_v57 = vadd.f32 %v2086_v58, %v222_v63  ;;  %1803 = vset.pattern.permute.xlu0 %v1844_v15  ;;  %1804 = vset.pattern.permute.xlu1 %v1844_v15 }
  0xae   :  { %774 = vmatpush.bf16.msrb.mxu0 %v2203_v47  ;;  %803 = vmatpush.bf16.msrb.mxu1 %v2209_v39  ;;  %v493_v34 = vmax.f32 %v365_v61, 0.0  ;;  %v223_v47 = vmul.f32 %v2326_v2, %v2088_v59  ;;  %v367_v39 = vadd.f32 %v3190_v30, %v207_v25  ;;  %v494_v4 = vmax.f32 %v366_v13, 0.0 }
  0xaf   :  { %832 = vmatpush.bf16.msrb.mxu2 %v2229_v32  ;;  %861 = vmatpush.bf16.msrb.mxu3 %v2245_v49  ;;  %v509_v14 = vmax.f32 %v381_v38, 0.0  ;;  %v3191_v32 = vld [vmem:[#allocation13_spill] sm:$0xff]  ;;  %v510_v54 = vmax.f32 %v382_v57, 0.0  ;;  %v188_v9 = vmul.f32 %v3188_v5, %v3194_v48  ;;  %v189_v60 = vmul.f32 %v2313_v51, %v3194_v48 }
  0xb0   :  { %v172_v49 = vmul.f32 %v3188_v5, %v3191_v32  ;;  %593 = vperm.xlu0 %1803, %v3192_v26   ;;  %597 = vperm.xlu1 %1804, %v3193_v52   ;;  %v173_v44 = vmul.f32 %v2313_v51, %v3191_v32  ;;  %v383_v41 = vadd.f32 %v2086_v58, %v223_v47  ;;  %v495_v55 = vmax.f32 %v367_v39, 0.0  ;;  %v2407_v47 = vld [vmem:[%s3136_s2 + $0x8] sm:$0xff] }
  0xb1   :  { %v581_v21 = vpack.c.bf16 %v509_v14, %v493_v34  ;;  %v582_v6 = vpack.c.bf16 %v510_v54, %v494_v4  ;;  %v348_v24 = vadd.f32 %v2143_v7, %v188_v9  ;;  %v174_v40 = vmul.f32 %v2318_v35, %v3191_v32  ;;  %1802 = vset.pattern.permute.xlu2 %v1844_v15  ;;  %v3196_v34 = vld [vmem:[#allocation15_spill] sm:$0xff] }
  0xb2   :  { %775 = vmatpush.bf16.msrb.mxu0 %v2254_v27  ;;  %804 = vmatpush.bf16.msrb.mxu1 %v2258_v0  ;;  %v332_v29 = vadd.f32 %v2152_v53, %v172_v49  ;;  %v511_v18 = vmax.f32 %v383_v41, 0.0  ;;  %v333_v0 = vadd.f32 %v2152_v53, %v173_v44  ;;  %v175_v22 = vmul.f32 %v2326_v2, %v3191_v32  ;;  %v3197_v44 = vld [vmem:[#allocation6_spill] sm:$0xff] }
  0xb3   :  { %833 = vmatpush.bf16.msrb.mxu2 %v2277_v36  ;;  %862 = vmatpush.bf16.msrb.mxu3 %v2293_v37  ;;  %v476_v46 = vmax.f32 %v348_v24, 0.0  ;;  %v349_v36 = vadd.f32 %v2143_v7, %v189_v60  ;;  %v190_v37 = vmul.f32 %v2318_v35, %v3194_v48  ;;  %v334_v12 = vadd.f32 %v2152_v53, %v174_v40 }
  0xb4   :  { %v460_v27 = vmax.f32 %v332_v29, 0.0  ;;  %589 = vperm.xlu2 %1802, %v3195_v19   ;;  %v583_v33 = vpack.c.bf16 %v511_v18, %v495_v55  ;;  %v461_v10 = vmax.f32 %v333_v0, 0.0  ;;  %v191_v61 = vmul.f32 %v2326_v2, %v3194_v48 }
  0xb5   :  { %v477_v63 = vmax.f32 %v349_v36, 0.0  ;;  %v350_v38 = vadd.f32 %v2143_v7, %v190_v37  ;;  %v335_v25 = vadd.f32 %v2152_v53, %v175_v22  ;;  %v140_v13 = vmul.f32 %v3188_v5, %v3196_v34 }
  0xb6   :  { %776 = vmatpush.bf16.msrb.mxu0 %v2295_v3  ;;  %805 = vmatpush.bf16.msrb.mxu1 %v2297_v17  ;;  %v564_v62 = vpack.c.bf16 %v476_v46, %v460_v27  ;;  %v462_v3 = vmax.f32 %v334_v12, 0.0  ;;  %v351_v17 = vadd.f32 %v2143_v7, %v191_v61  ;;  %v156_v57 = vmul.f32 %v3188_v5, %v2189_v42 }
  0xb7   :  { %834 = vmatpush.bf16.msrb.mxu2 %v2330_v11  ;;  %863 = vmatpush.bf16.msrb.mxu3 %v531_v1  ;;  %v565_v11 = vpack.c.bf16 %v477_v63, %v461_v10  ;;  %v478_v1 = vmax.f32 %v350_v38, 0.0  ;;  %v463_v14 = vmax.f32 %v335_v25, 0.0  ;;  %v300_v49 = vadd.f32 %v2052_v56, %v140_v13 }
  0xb8   :  { %v479_v39 = vmax.f32 %v351_v17, 0.0  ;;  %v316_v4 = vadd.f32 %v2187_v43, %v156_v57  ;;  %v157_v54 = vmul.f32 %v2313_v51, %v2189_v42  ;;  %v1845_v9 = vmov 3   ;;  %605 = vperm.xlu1 %1804, %v3197_v44  }
  0xb9   :  { %1806 = vset.pattern.permute.xlu0 %v1845_v9  ;;  %v142_v29 = vmul.f32 %v2318_v35, %v3196_v34  ;;  %v428_v24 = vmax.f32 %v300_v49, 0.0  ;;  %1721 = vmatmul.msk.bf16.gmra.mxu0 %vm640_vm0, %v2407_v47  ;;  %v143_v46 = vmul.f32 %v2326_v2, %v3196_v34  ;;  %v159_v37 = vmul.f32 %v2326_v2, %v2189_v42 }
  0xba   :  { %889 = vmatpush.bf16.msra.mxu0 %v580_v20  ;;  %918 = vmatpush.bf16.msra.mxu1 %v581_v21  ;;  %v141_v20 = vmul.f32 %v2313_v51, %v3196_v34  ;;  %v566_v21 = vpack.c.bf16 %v478_v1, %v462_v3  ;;  %v567_v55 = vpack.c.bf16 %v479_v39, %v463_v14  ;;  %v444_v60 = vmax.f32 %v316_v4, 0.0 }
  0xbb   :  { %947 = vmatpush.bf16.msra.mxu2 %v582_v6  ;;  %976 = vmatpush.bf16.msra.mxu3 %v583_v33  ;;  %v158_v6 = vmul.f32 %v2318_v35, %v2189_v42  ;;  %v317_v18 = vadd.f32 %v2187_v43, %v157_v54  ;;  %v302_v0 = vadd.f32 %v2052_v56, %v142_v29 }
  0xbc   :  { %v301_v41 = vadd.f32 %v2052_v56, %v141_v20  ;;  %1250 = vperm.xlu0 %1806, %v3192_v26   ;;  %1725 = vmatmul.msk.bf16.gmra.mxu1 %vm640_vm0, %v2407_v47  ;;  %v548_v26 = vpack.c.bf16 %v444_v60, %v428_v24  ;;  %v108_v22 = vmul.f32 %v3188_v5, %v2227_v31 }
  0xbd   :  { %v318_v40 = vadd.f32 %v2187_v43, %v158_v6  ;;  %v445_v36 = vmax.f32 %v317_v18, 0.0  ;;  %1729 = vmatmul.msk.bf16.gmra.mxu2 %vm640_vm0, %v2407_v47  ;;  %1733 = vmatmul.msk.bf16.gmra.mxu3 %vm640_vm0, %v2407_v47  ;;  %v430_v33 = vmax.f32 %v302_v0, 0.0  ;;  %v303_v12 = vadd.f32 %v2052_v56, %v143_v46 }
  0xbe   :  { %890 = vmatpush.bf16.msra.mxu0 %v564_v62  ;;  %919 = vmatpush.bf16.msra.mxu1 %v565_v11  ;;  %v429_v27 = vmax.f32 %v301_v41, 0.0  ;;  %v124_v61 = vmul.f32 %v3188_v5, %v2123_v8  ;;  %v319_v63 = vadd.f32 %v2187_v43, %v159_v37  ;;  %v268_v38 = vadd.f32 %v2241_v16, %v108_v22  ;;  %v3198_v11 = vld [vmem:[#allocation10_spill] sm:$0xff]  ;;  %v3201_v37 = vld [vmem:[#allocation7_spill] sm:$0xff] }
  0xbf   :  { %948 = vmatpush.bf16.msra.mxu2 %v566_v21  ;;  %977 = vmatpush.bf16.msra.mxu3 %v567_v55  ;;  %v446_v10 = vmax.f32 %v318_v40, 0.0  ;;  %v109_v25 = vmul.f32 %v2313_v51, %v2227_v31  ;;  %v431_v17 = vmax.f32 %v303_v12, 0.0  ;;  %v125_v57 = vmul.f32 %v2313_v51, %v2123_v8 }
  0xc0   :  { %v549_v62 = vpack.c.bf16 %v445_v36, %v429_v27  ;;  %v284_v13 = vadd.f32 %v2275_v50, %v124_v61  ;;  %601 = vperm.xlu2 %1802, %v3198_v11   ;;  %v447_v5 = vmax.f32 %v319_v63, 0.0  ;;  %v396_v1 = vmax.f32 %v268_v38, 0.0  ;;  %1807 = vset.pattern.permute.xlu1 %v1845_v9 }
  0xc1   :  { %v550_v3 = vpack.c.bf16 %v446_v10, %v430_v33  ;;  %v269_v14 = vadd.f32 %v2241_v16, %v109_v25  ;;  %v110_v20 = vmul.f32 %v2318_v35, %v2227_v31  ;;  %v285_v49 = vadd.f32 %v2275_v50, %v125_v57  ;;  %1254 = vperm.xlu1 %1807, %v3193_v52  }
  0xc2   :  { %891 = vmatpush.bf16.msra.mxu0 %v548_v26  ;;  %920 = vmatpush.bf16.msra.mxu1 %v549_v62  ;;  %v412_v39 = vmax.f32 %v284_v13, 0.0  ;;  %v126_v4 = vmul.f32 %v2318_v35, %v2123_v8  ;;  %v111_v51 = vmul.f32 %v2326_v2, %v2227_v31  ;;  %v551_v54 = vpack.c.bf16 %v447_v5, %v431_v17  ;;  %v3199_v26 = vld [vmem:[#allocation5_spill] sm:$0xff] }
  0xc3   :  { %949 = vmatpush.bf16.msra.mxu2 %v550_v3  ;;  %v397_v21 = vmax.f32 %v269_v14, 0.0  ;;  %v270_v41 = vadd.f32 %v2241_v16, %v110_v20  ;;  %v127_v29 = vmul.f32 %v2326_v2, %v2123_v8  ;;  %v413_v55 = vmax.f32 %v285_v49, 0.0  ;;  %v2471_v2 = vld [vmem:[%s3136_s2 + $0x10] sm:$0xff] }
  0xc4   :  { %1262 = vperm.xlu0 %1806, %v3197_v44   ;;  %v532_v6 = vpack.c.bf16 %v412_v39, %v396_v1  ;;  %v286_v24 = vadd.f32 %v2275_v50, %v126_v4  ;;  %v271_v35 = vadd.f32 %v2241_v16, %v111_v51  ;;  %978 = vmatpush.bf16.msra.mxu3 %v551_v54  ;;  %v2489_v36 = vperm.slane %v3189_v45, 4 }
  0xc5   :  { %v287_v60 = vadd.f32 %v2275_v50, %v127_v29  ;;  %v533_v52 = vpack.c.bf16 %v413_v55, %v397_v21  ;;  %v398_v18 = vmax.f32 %v270_v41, 0.0  ;;  %v2497_v10 = vperm.slane %v3189_v45, 5 }
  0xc6   :  { %892 = vmatpush.bf16.msra.mxu0 %v532_v6  ;;  %v414_v27 = vmax.f32 %v286_v24, 0.0  ;;  %v399_v0 = vmax.f32 %v271_v35, 0.0  ;;  %v208_v22 = vmul.f32 %v2489_v36, %v3187_v23  ;;  %v224_v33 = vmul.f32 %v2489_v36, %v2088_v59 }
  0xc7   :  { %v415_v40 = vmax.f32 %v287_v60, 0.0  ;;  %921 = vmatpush.bf16.msra.mxu1 %v533_v52  ;;  %v2500_v12 = vperm.slane %v3189_v45, 6  ;;  %v209_v63 = vmul.f32 %v2497_v10, %v3187_v23  ;;  %v2512_v38 = vperm.slane %v3189_v45, 7 }
  0xc8   :  { %v534_v46 = vpack.c.bf16 %v414_v27, %v398_v18  ;;  %1805 = vset.pattern.permute.xlu2 %v1845_v9  ;;  %v368_v61 = vadd.f32 %v3190_v30, %v208_v22  ;;  %v384_v62 = vadd.f32 %v2086_v58, %v224_v33  ;;  %v225_v25 = vmul.f32 %v2497_v10, %v2088_v59  ;;  %v1814_v18 = vld [vmem:[%s3135_s1 + $0x28] sm:$0xff] }
  0xc9   :  { %v535_v44 = vpack.c.bf16 %v415_v40, %v399_v0  ;;  %1246 = vperm.xlu2 %1805, %v3195_v19   ;;  %1258 = vperm.xlu1 %1807, %v3198_v11   ;;  %v3200_v19 = vld [vmem:[#allocation8_spill] sm:$0xff]  ;;  %v210_v3 = vmul.f32 %v2500_v12, %v3187_v23  ;;  %v226_v17 = vmul.f32 %v2500_v12, %v2088_v59 }
  0xca   :  { %950 = vmatpush.bf16.msra.mxu2 %v534_v46  ;;  %1722 = vmatmul.msk.bf16.gmra.mxu0 %vm640_vm0, %v2471_v2  ;;  %v227_v45 = vmul.f32 %v2512_v38, %v2088_v59  ;;  %v496_v13 = vmax.f32 %v368_v61, 0.0  ;;  %v512_v57 = vmax.f32 %v384_v62, 0.0  ;;  %v369_v11 = vadd.f32 %v3190_v30, %v209_v63 }
  0xcb   :  { %979 = vmatpush.bf16.msra.mxu3 %v535_v44  ;;  %v211_v5 = vmul.f32 %v2512_v38, %v3187_v23  ;;  %v385_v59 = vadd.f32 %v2086_v58, %v225_v25  ;;  %v370_v1 = vadd.f32 %v3190_v30, %v210_v3  ;;  %v176_v14 = vmul.f32 %v2489_v36, %v3191_v32 }
  0xcc   :  { %1270 = vperm.xlu0 %1806, %v3199_v26   ;;  %1726 = vmatmul.msk.bf16.gmra.mxu1 %vm640_vm0, %v2471_v2  ;;  %v192_v20 = vmul.f32 %v2489_v36, %v3194_v48  ;;  %v386_v39 = vadd.f32 %v2086_v58, %v226_v17  ;;  %v387_v49 = vadd.f32 %v2086_v58, %v227_v45  ;;  %v497_v24 = vmax.f32 %v369_v11, 0.0 }
  0xcd   :  { %1730 = vmatmul.msk.bf16.gmra.mxu2 %vm640_vm0, %v2471_v2  ;;  %1734 = vmatmul.msk.bf16.gmra.mxu3 %vm640_vm0, %v2471_v2  ;;  %v177_v4 = vmul.f32 %v2497_v10, %v3191_v32  ;;  %v193_v23 = vmul.f32 %v2497_v10, %v3194_v48  ;;  %v336_v51 = vadd.f32 %v2152_v53, %v176_v14  ;;  %v513_v35 = vmax.f32 %v385_v59, 0.0 }
  0xce   :  { %v352_v54 = vadd.f32 %v2143_v7, %v192_v20  ;;  %v178_v21 = vmul.f32 %v2500_v12, %v3191_v32  ;;  %v194_v41 = vmul.f32 %v2500_v12, %v3194_v48  ;;  %v584_v29 = vpack.c.bf16 %v512_v57, %v496_v13 }
  0xcf   :  { %v371_v6 = vadd.f32 %v3190_v30, %v211_v5  ;;  %v337_v58 = vadd.f32 %v2152_v53, %v177_v4  ;;  %v353_v55 = vadd.f32 %v2143_v7, %v193_v23  ;;  %v498_v27 = vmax.f32 %v370_v1, 0.0 }
  0xd0   :  { %v338_v60 = vadd.f32 %v2152_v53, %v178_v21  ;;  %v354_v52 = vadd.f32 %v2143_v7, %v194_v41  ;;  %v514_v0 = vmax.f32 %v386_v39, 0.0  ;;  %v515_v30 = vmax.f32 %v387_v49, 0.0 }
  0xd1   :  { %1808 = vset.pattern.permute.xlu2 %v1844_v15  ;;  %1809 = vset.pattern.permute.xlu1 %v1844_v15  ;;  %v2505_v15 = vld [vmem:[%s3136_s2 + $0x18] sm:$0xff]  ;;  %v179_v40 = vmul.f32 %v2512_v38, %v3191_v32  ;;  %v464_v46 = vmax.f32 %v336_v51, 0.0  ;;  %v480_v44 = vmax.f32 %v352_v54, 0.0  ;;  %v481_v22 = vmax.f32 %v353_v55, 0.0 }
  0xd2   :  { %609 = vperm.xlu2 %1808, %v3200_v19   ;;  %617 = vperm.xlu1 %1809, %v3201_v37   ;;  %v499_v19 = vmax.f32 %v371_v6, 0.0  ;;  %v466_v61 = vmax.f32 %v338_v60, 0.0  ;;  %v482_v62 = vmax.f32 %v354_v52, 0.0  ;;  %v144_v32 = vmul.f32 %v2489_v36, %v3196_v34 }
  0xd3   :  { %v339_v33 = vadd.f32 %v2152_v53, %v179_v40  ;;  %v585_v25 = vpack.c.bf16 %v513_v35, %v497_v24  ;;  %v145_v3 = vmul.f32 %v2497_v10, %v3196_v34  ;;  %v162_v17 = vmul.f32 %v2500_v12, %v2189_v42 }
  0xd4   :  { %v586_v45 = vpack.c.bf16 %v514_v0, %v498_v27  ;;  %v587_v13 = vpack.c.bf16 %v515_v30, %v499_v19  ;;  %v568_v53 = vpack.c.bf16 %v480_v44, %v464_v46  ;;  %v146_v5 = vmul.f32 %v2500_v12, %v3196_v34 }
  0xd5   :  { %v163_v59 = vmul.f32 %v2512_v38, %v2189_v42  ;;  %v570_v1 = vpack.c.bf16 %v482_v62, %v466_v61  ;;  %v304_v20 = vadd.f32 %v2052_v56, %v144_v32  ;;  %v128_v39 = vmul.f32 %v2489_v36, %v2123_v8 }
  0xd6   :  { %v305_v49 = vadd.f32 %v2052_v56, %v145_v3  ;;  %v322_v23 = vadd.f32 %v2187_v43, %v162_v17  ;;  %v147_v51 = vmul.f32 %v2512_v38, %v3196_v34  ;;  %v112_v54 = vmul.f32 %v2489_v36, %v2227_v31 }
  0xd7   :  { %v129_v21 = vmul.f32 %v2497_v10, %v2123_v8  ;;  %v130_v41 = vmul.f32 %v2500_v12, %v2123_v8  ;;  %v306_v34 = vadd.f32 %v2052_v56, %v146_v5  ;;  %v131_v6 = vmul.f32 %v2512_v38, %v2123_v8 }
  0xd8   :  { %v113_v55 = vmul.f32 %v2497_v10, %v2227_v31  ;;  %v114_v24 = vmul.f32 %v2500_v12, %v2227_v31  ;;  %v307_v52 = vadd.f32 %v2052_v56, %v147_v51  ;;  %v1846_v8 = vmov 4   ;;  %v1815_v12 = vld [vmem:[%s3135_s1] sm:$0xff]  ;;  %s1847_s1 = smov [#allocation2]  }
  0xd9   :  { %v272_v27 = vadd.f32 %v2241_v16, %v112_v54  ;;  %v289_v0 = vadd.f32 %v2275_v50, %v129_v21  ;;  %v433_v56 = vmax.f32 %v305_v49, 0.0  ;;  %1813 = vset.pattern.permute.xlu0 %v1846_v8  ;;  %s1693_s15 = sshll.u32 %s1847_s1, 4  ;;  %s1694_s15 = int_to_ptr.vmem [resolvable:$true] %s1693_s15 }
  0xda   :  { %613 = vperm.xlu2 %1808, %v3199_v26   ;;  %1811 = vset.pattern.permute.xlu1 %v1845_v9  ;;  %v160_v26 = vmul.f32 %v2489_v36, %v2189_v42  ;;  %v432_v36 = vmax.f32 %v304_v20, 0.0  ;;  %v273_v44 = vadd.f32 %v2241_v16, %v113_v55  ;;  %v435_v19 = vmax.f32 %v307_v52, 0.0 }
  0xdb   :  { %1723 = vmatmul.msk.bf16.gmra.mxu0 %vm640_vm0, %v2505_v15  ;;  %1274 = vperm.xlu1 %1811, %v3201_v37   ;;  %v465_v37 = vmax.f32 %v337_v58, 0.0  ;;  %v288_v58 = vadd.f32 %v2275_v50, %v128_v39  ;;  %v417_v61 = vmax.f32 %v289_v0, 0.0 }
  0xdc   :  { %1727 = vmatmul.msk.bf16.gmra.mxu1 %vm640_vm0, %v2505_v15  ;;  %v320_v57 = vadd.f32 %v2187_v43, %v160_v26 }
  0xdd   :  { %1731 = vmatmul.msk.bf16.gmra.mxu2 %vm640_vm0, %v2505_v15  ;;  %1735 = vmatmul.msk.bf16.gmra.mxu3 %vm640_vm0, %v2505_v15  ;;  %v569_v11 = vpack.c.bf16 %v481_v22, %v465_v37  ;;  %v416_v46 = vmax.f32 %v288_v58, 0.0 }
  0xe2   :  { %1810 = vset.pattern.permute.xlu2 %v1845_v9  ;;  %v195_v9 = vmul.f32 %v2512_v38, %v3194_v48  ;;  %v161_v48 = vmul.f32 %v2497_v10, %v2189_v42  ;;  %v448_v42 = vmax.f32 %v320_v57, 0.0  ;;  %v290_v10 = vadd.f32 %v2275_v50, %v130_v41 }
  0xe3   :  { %1266 = vperm.xlu2 %1810, %v1814_v18   ;;  %v450_v18 = vmax.f32 %v322_v23, 0.0 }
  0xe4   :  { %v355_v63 = vadd.f32 %v2143_v7, %v195_v9  ;;  %v467_v7 = vmax.f32 %v339_v33, 0.0  ;;  %v321_v4 = vadd.f32 %v2187_v43, %v161_v48  ;;  %v552_v30 = vpack.c.bf16 %v448_v42, %v432_v36 }
  0xe5   :  { %v274_v9 = vadd.f32 %v2241_v16, %v114_v24  ;;  %v400_v33 = vmax.f32 %v272_v27, 0.0  ;;  %v418_v62 = vmax.f32 %v290_v10, 0.0 }
  0xe6   :  { %v483_v14 = vmax.f32 %v355_v63, 0.0  ;;  %v449_v60 = vmax.f32 %v321_v4, 0.0 }
  0xe7   :  { %v536_v32 = vpack.c.bf16 %v416_v46, %v400_v33  ;;  %v402_v3 = vmax.f32 %v274_v9, 0.0 }
  0xe8   :  { %v571_v35 = vpack.c.bf16 %v483_v14, %v467_v7  ;;  %v553_v26 = vpack.c.bf16 %v449_v60, %v433_v56 }
  0xeb   :  { %1736 = vmatmul.msk.bf16.vlgmr.msrb.gmra.mxu0 %vm640_vm0, %v2304_v28  ;;  %1812 = vset.pattern.permute.xlu2 %v1846_v8 }
  0xec   :  { %1740 = vmatmul.msk.bf16.vlgmr.msrb.gmra.mxu1 %vm640_vm0, %v2304_v28  ;;  %1005 = vmatpush.bf16.msrb.mxu0 %v584_v29  ;;  %v323_v29 = vadd.f32 %v2187_v43, %v163_v59  ;;  %v115_v43 = vmul.f32 %v2512_v38, %v2227_v31  ;;  %v291_v31 = vadd.f32 %v2275_v50, %v131_v6  ;;  %v434_v38 = vmax.f32 %v306_v34, 0.0 }
  0xed   :  { %1744 = vmatmul.msk.bf16.vlgmr.msrb.gmra.mxu2 %vm640_vm0, %v2304_v28  ;;  %1748 = vmatmul.msk.bf16.vlgmr.msrb.gmra.mxu3 %vm640_vm0, %v2304_v28 }
  0xee   :  { %1034 = vmatpush.bf16.msrb.mxu1 %v585_v25  ;;  %1063 = vmatpush.bf16.msrb.mxu2 %v586_v45  ;;  %v451_v40 = vmax.f32 %v323_v29, 0.0  ;;  %v275_v37 = vadd.f32 %v2241_v16, %v115_v43  ;;  %v554_v22 = vpack.c.bf16 %v450_v18, %v434_v38  ;;  %v419_v63 = vmax.f32 %v291_v31, 0.0 }
  0xef   :  { %1092 = vmatpush.bf16.msrb.mxu3 %v587_v13  ;;  %1614 = vperm.xlu2 %1812, %v1815_v12   ;;  %v401_v25 = vmax.f32 %v273_v44, 0.0  ;;  %v538_v45 = vpack.c.bf16 %v418_v62, %v402_v3 }
  0xf0   :  { %1006 = vmatpush.bf16.msrb.mxu0 %v568_v53  ;;  %v555_v50 = vpack.c.bf16 %v451_v40, %v435_v19  ;;  %v403_v48 = vmax.f32 %v275_v37, 0.0 }
  0xf1   :  { %v537_v17 = vpack.c.bf16 %v417_v61, %v401_v25 }
  0xf2   :  { %1035 = vmatpush.bf16.msrb.mxu1 %v569_v11  ;;  %1064 = vmatpush.bf16.msrb.mxu2 %v570_v1  ;;  %v539_v13 = vpack.c.bf16 %v419_v63, %v403_v48 }
  0xf3   :  { %1093 = vmatpush.bf16.msrb.mxu3 %v571_v35 }
  0xf4   :  { %1007 = vmatpush.bf16.msrb.mxu0 %v552_v30 }
  0xf6   :  { %1036 = vmatpush.bf16.msrb.mxu1 %v553_v26  ;;  %1065 = vmatpush.bf16.msrb.mxu2 %v554_v22 }
  0xf7   :  { %1094 = vmatpush.bf16.msrb.mxu3 %v555_v50 }
  0xf8   :  { %1008 = vmatpush.bf16.msrb.mxu0 %v536_v32 }
  0xfa   :  { %1037 = vmatpush.bf16.msrb.mxu1 %v537_v17  ;;  %1066 = vmatpush.bf16.msrb.mxu2 %v538_v45 }
  0xfb   :  { %1095 = vmatpush.bf16.msrb.mxu3 %v539_v13  ;;  %1737 = vmatmul.msk.bf16.gmra.mxu0 %vm640_vm0, %v2407_v47 }
  0xfc   :  { %1741 = vmatmul.msk.bf16.gmra.mxu1 %vm640_vm0, %v2407_v47 }
  0xfd   :  { %1745 = vmatmul.msk.bf16.gmra.mxu2 %vm640_vm0, %v2407_v47  ;;  %1749 = vmatmul.msk.bf16.gmra.mxu3 %vm640_vm0, %v2407_v47 }
 0x10b   :  { %1738 = vmatmul.msk.bf16.gmra.mxu0 %vm640_vm0, %v2471_v2 }
 0x10c   :  { %1742 = vmatmul.msk.bf16.gmra.mxu1 %vm640_vm0, %v2471_v2 }
 0x10d   :  { %1746 = vmatmul.msk.bf16.gmra.mxu2 %vm640_vm0, %v2471_v2  ;;  %1750 = vmatmul.msk.bf16.gmra.mxu3 %vm640_vm0, %v2471_v2 }
 0x10e   :  { %v2652_v16 = vpop.permute.xlu2 %589 }
 0x11a   :  { %v2662_v11 = vpop.permute.xlu2 %601 }
 0x11b   :  { %1739 = vmatmul.msk.bf16.gmra.mxu0 %vm640_vm0, %v2505_v15 }
 0x11c   :  { %1743 = vmatmul.msk.bf16.gmra.mxu1 %vm640_vm0, %v2505_v15 }
 0x11d   :  { %1747 = vmatmul.msk.bf16.gmra.mxu2 %vm640_vm0, %v2505_v15  ;;  %1751 = vmatmul.msk.bf16.gmra.mxu3 %vm640_vm0, %v2505_v15 }
 0x122   :  { %v2668_v7 = vpop.permute.xlu1 %597  ;;  %v2674_v20 = vpop.permute.xlu0 %593 }
 0x123   :  { %v2678_v54 = vpop.permute.xlu2 %1246 }
 0x126   :  { %v2654_v53 = vpop.f32.mrf.mxu0  ;;  %v2656_v57 = vpop.f32.mrf.mxu1 }
 0x12a   :  { %v2682_v34 = vpop.permute.xlu1 %605 }
 0x12b   :  { %1752 = vmatmul.msk.bf16.vlgmr.msra.gmra.mxu0 %vm640_vm0, %v2304_v28 }
 0x12c   :  { %1756 = vmatmul.msk.bf16.vlgmr.msra.gmra.mxu1 %vm640_vm0, %v2304_v28  ;;  %v2712_v26 = vpop.permute.xlu2 %609 }
 0x12d   :  { %1760 = vmatmul.msk.bf16.vlgmr.msra.gmra.mxu2 %vm640_vm0, %v2304_v28  ;;  %1764 = vmatmul.msk.bf16.vlgmr.msra.gmra.mxu3 %vm640_vm0, %v2304_v28 }
 0x12e   :  { %v2670_v1 = vpop.f32.mrf.mxu0  ;;  %v2672_v14 = vpop.f32.mrf.mxu1 }
 0x12f   :  { %v720_v5 = vpop.f32.mrf.mxu2  ;;  %v749_v59 = vpop.f32.mrf.mxu3 }
 0x130   :  { %v721_v39 = vadd.f32 %v720_v5, %v2652_v16  ;;  %v750_v49 = vadd.f32 %v749_v59, %v2652_v16  ;;  %v2688_v55 = vpop.permute.xlu0 %1250 }
 0x132   :  { %v1119_v51 = vmax.f32 %v721_v39, 0.0  ;;  %v1120_v42 = vmax.f32 %v750_v49, 0.0 }
 0x133   :  { %v2708_v56 = vpop.permute.xlu1 %1254 }
 0x134   :  { %v1279_v24 = vmul.f32 %v2678_v54, %v1119_v51  ;;  %v1280_v60 = vmul.f32 %v2678_v54, %v1120_v42 }
 0x136   :  { %v2684_v29 = vpop.f32.mrf.mxu0 }
 0x137   :  { %v722_v4 = vpop.f32.mrf.mxu2  ;;  %v751_v23 = vpop.f32.mrf.mxu3 }
 0x138   :  { %v723_v21 = vadd.f32 %v722_v4, %v2674_v20  ;;  %v752_v41 = vadd.f32 %v751_v23, %v2674_v20  ;;  %v2738_v4 = vpop.permute.xlu2 %613  ;;  %v2740_v42 = vpop.permute.xlu0 %1262 }
 0x139   :  { %v2686_v58 = vpop.f32.mrf.mxu1 }
 0x13a   :  { %v1135_v6 = vmax.f32 %v723_v21, 0.0  ;;  %v1136_v36 = vmax.f32 %v752_v41, 0.0 }
 0x13b   :  { %1753 = vmatmul.msk.bf16.gmra.mxu0 %vm640_vm0, %v2407_v47  ;;  %v2722_v32 = vpop.permute.xlu1 %1258 }
 0x13c   :  { %v1295_v35 = vmul.f32 %v2688_v55, %v1135_v6  ;;  %v1296_v52 = vmul.f32 %v2688_v55, %v1136_v36  ;;  %1757 = vmatmul.msk.bf16.gmra.mxu1 %vm640_vm0, %v2407_v47 }
 0x13d   :  { %1761 = vmatmul.msk.bf16.gmra.mxu2 %vm640_vm0, %v2407_v47  ;;  %1765 = vmatmul.msk.bf16.gmra.mxu3 %vm640_vm0, %v2407_v47 }
 0x13e   :  { %v1431_v43 = vadd.f32 %v1295_v35, %v1279_v24  ;;  %v1444_v8 = vadd.f32 %v1296_v52, %v1280_v60  ;;  %v2704_v12 = vpop.f32.mrf.mxu0 }
 0x140   :  { %v725_v18 = vpop.f32.mrf.mxu2  ;;  %v754_v27 = vpop.f32.mrf.mxu3 }
 0x141   :  { %v726_v0 = vadd.f32 %v725_v18, %v2668_v7  ;;  %v755_v10 = vadd.f32 %v754_v27, %v2668_v7  ;;  %v2706_v30 = vpop.f32.mrf.mxu1 }
 0x143   :  { %v1151_v40 = vmax.f32 %v726_v0, 0.0  ;;  %v1152_v31 = vmax.f32 %v755_v10, 0.0  ;;  %v2752_v0 = vpop.permute.xlu2 %1266 }
 0x145   :  { %v1311_v38 = vmul.f32 %v2708_v56, %v1151_v40  ;;  %v1312_v46 = vmul.f32 %v2708_v56, %v1152_v31 }
 0x147   :  { %v1432_v44 = vadd.f32 %v1431_v43, %v1311_v38  ;;  %v1445_v9 = vadd.f32 %v1444_v8, %v1312_v46  ;;  %v2716_v61 = vpop.f32.mrf.mxu0 }
 0x148   :  { %v727_v19 = vpop.f32.mrf.mxu2  ;;  %v756_v37 = vpop.f32.mrf.mxu3 }
 0x149   :  { %v728_v22 = vadd.f32 %v727_v19, %v2662_v11  ;;  %v757_v33 = vadd.f32 %v756_v37, %v2662_v11  ;;  %v2718_v62 = vpop.f32.mrf.mxu1 }
 0x14b   :  { %v1167_v50 = vmax.f32 %v728_v22, 0.0  ;;  %v1168_v63 = vmax.f32 %v757_v33, 0.0  ;;  %1754 = vmatmul.msk.bf16.gmra.mxu0 %vm640_vm0, %v2471_v2  ;;  %v2768_v33 = vpop.permute.xlu1 %617 }
 0x14c   :  { %1758 = vmatmul.msk.bf16.gmra.mxu1 %vm640_vm0, %v2471_v2 }
 0x14d   :  { %v1327_v25 = vmul.f32 %v2722_v32, %v1167_v50  ;;  %v1328_v3 = vmul.f32 %v2722_v32, %v1168_v63  ;;  %1762 = vmatmul.msk.bf16.gmra.mxu2 %vm640_vm0, %v2471_v2  ;;  %1766 = vmatmul.msk.bf16.gmra.mxu3 %vm640_vm0, %v2471_v2 }
 0x14f   :  { %v1433_v48 = vadd.f32 %v1432_v44, %v1327_v25  ;;  %v1446_v17 = vadd.f32 %v1445_v9, %v1328_v3  ;;  %v2734_v39 = vpop.f32.mrf.mxu0  ;;  %v2770_v25 = vpop.permute.xlu0 %1270 }
 0x150   :  { %v730_v45 = vpop.f32.mrf.mxu2  ;;  %v759_v13 = vpop.f32.mrf.mxu3 }
 0x151   :  { %v731_v5 = vadd.f32 %v730_v45, %v2682_v34  ;;  %v760_v59 = vadd.f32 %v759_v13, %v2682_v34  ;;  %v2736_v49 = vpop.f32.mrf.mxu1  ;;  %v694_v45 = vadd.f32 %v2672_v14, %v2674_v20 }
 0x153   :  { %v1183_v23 = vmax.f32 %v731_v5, 0.0  ;;  %v1184_v51 = vmax.f32 %v760_v59, 0.0  ;;  %v663_v59 = vadd.f32 %v2654_v53, %v2652_v16 }
 0x155   :  { %v1343_v21 = vmul.f32 %v2740_v42, %v1183_v23  ;;  %v1344_v41 = vmul.f32 %v2740_v42, %v1184_v51  ;;  %v692_v23 = vadd.f32 %v2656_v57, %v2652_v16 }
 0x157   :  { %v1434_v6 = vadd.f32 %v1433_v48, %v1343_v21  ;;  %v1447_v36 = vadd.f32 %v1446_v17, %v1344_v41  ;;  %v665_v17 = vadd.f32 %v2670_v1, %v2674_v20  ;;  %v1118_v53 = vmax.f32 %v692_v23, 0.0 }
 0x158   :  { %v732_v24 = vpop.f32.mrf.mxu2  ;;  %v761_v35 = vpop.f32.mrf.mxu3 }
 0x159   :  { %v733_v60 = vadd.f32 %v732_v24, %v2712_v26  ;;  %v762_v52 = vadd.f32 %v761_v35, %v2712_v26  ;;  %v2746_v43 = vpop.f32.mrf.mxu0  ;;  %v2748_v8 = vpop.f32.mrf.mxu1  ;;  %v1133_v1 = vmax.f32 %v665_v17, 0.0  ;;  %v1134_v35 = vmax.f32 %v694_v45, 0.0 }
 0x15b   :  { %v1199_v18 = vmax.f32 %v733_v60, 0.0  ;;  %v1200_v27 = vmax.f32 %v762_v52, 0.0  ;;  %1755 = vmatmul.msk.bf16.gmra.mxu0 %vm640_vm0, %v2505_v15  ;;  %v1117_v52 = vmax.f32 %v663_v59, 0.0 }
 0x15c   :  { %1759 = vmatmul.msk.bf16.gmra.mxu1 %vm640_vm0, %v2505_v15 }
 0x15d   :  { %v1359_v10 = vmul.f32 %v2752_v0, %v1199_v18  ;;  %v1360_v40 = vmul.f32 %v2752_v0, %v1200_v27  ;;  %1763 = vmatmul.msk.bf16.gmra.mxu2 %vm640_vm0, %v2505_v15  ;;  %1767 = vmatmul.msk.bf16.gmra.mxu3 %vm640_vm0, %v2505_v15  ;;  %v2786_v18 = vpop.permute.xlu1 %1274 }
 0x15f   :  { %v1435_v31 = vadd.f32 %v1434_v6, %v1359_v10  ;;  %v1448_v38 = vadd.f32 %v1447_v36, %v1360_v40 }
 0x160   :  { %v735_v46 = vpop.f32.mrf.mxu2  ;;  %v764_v44 = vpop.f32.mrf.mxu3 }
 0x161   :  { %v736_v9 = vadd.f32 %v735_v46, %v2738_v4  ;;  %v765_v19 = vadd.f32 %v764_v44, %v2738_v4  ;;  %v2764_v37 = vpop.f32.mrf.mxu0  ;;  %v2766_v22 = vpop.f32.mrf.mxu1 }
 0x163   :  { %v1215_v50 = vmax.f32 %v736_v9, 0.0  ;;  %v1216_v63 = vmax.f32 %v765_v19, 0.0  ;;  %v1293_v9 = vmul.f32 %v2688_v55, %v1133_v1  ;;  %v1294_v19 = vmul.f32 %v2688_v55, %v1134_v35 }
 0x165   :  { %v1375_v3 = vmul.f32 %v2770_v25, %v1215_v50  ;;  %v1376_v48 = vmul.f32 %v2770_v25, %v1216_v63 }
 0x167   :  { %v1436_v13 = vadd.f32 %v1435_v31, %v1375_v3  ;;  %v1449_v5 = vadd.f32 %v1448_v38, %v1376_v48  ;;  %v668_v31 = vadd.f32 %v2684_v29, %v2668_v7  ;;  %v697_v38 = vadd.f32 %v2686_v58, %v2668_v7 }
 0x168   :  { %v737_v51 = vpop.f32.mrf.mxu2  ;;  %v766_v21 = vpop.f32.mrf.mxu3  ;;  %v1277_v3 = vmul.f32 %v2678_v54, %v1117_v52  ;;  %v699_v52 = vadd.f32 %v2706_v30, %v2662_v11 }
 0x169   :  { %v738_v41 = vadd.f32 %v737_v51, %v2768_v33  ;;  %v767_v6 = vadd.f32 %v766_v21, %v2768_v33  ;;  %v778_v36 = vpop.f32.mrf.mxu0  ;;  %v807_v24 = vpop.f32.mrf.mxu1  ;;  %v1149_v23 = vmax.f32 %v668_v31, 0.0  ;;  %v1150_v51 = vmax.f32 %v697_v38, 0.0 }
 0x16a   :  { %v779_v57 = vadd.f32 %v778_v36, %v2652_v16  ;;  %v808_v40 = vadd.f32 %v807_v24, %v2652_v16 }
 0x16b   :  { %v1231_v60 = vmax.f32 %v738_v41, 0.0  ;;  %v1232_v14 = vmax.f32 %v767_v6, 0.0  ;;  %1768 = vmatmul.msk.bf16.vlgmr.msrb.gmra.mxu0 %vm640_vm0, %v2304_v28 }
 0x16c   :  { %1772 = vmatmul.msk.bf16.vlgmr.msrb.gmra.mxu1 %vm640_vm0, %v2304_v28  ;;  %v1121_v48 = vmax.f32 %v779_v57, 0.0  ;;  %v1122_v17 = vmax.f32 %v808_v40, 0.0  ;;  %v1310_v57 = vmul.f32 %v2708_v56, %v1150_v51 }
 0x16d   :  { %v1391_v27 = vmul.f32 %v2786_v18, %v1231_v60  ;;  %v1392_v10 = vmul.f32 %v2786_v18, %v1232_v14  ;;  %1776 = vmatmul.msk.bf16.vlgmr.msrb.gmra.mxu2 %vm640_vm0, %v2304_v28  ;;  %1780 = vmatmul.msk.bf16.vlgmr.msrb.gmra.mxu3 %vm640_vm0, %v2304_v28  ;;  %v1278_v28 = vmul.f32 %v2678_v54, %v1118_v53 }
 0x16e   :  { %v1281_v24 = vmul.f32 %v2678_v54, %v1121_v48  ;;  %v1282_v1 = vmul.f32 %v2678_v54, %v1122_v17  ;;  %v670_v14 = vadd.f32 %v2704_v12, %v2662_v11  ;;  %v1309_v53 = vmul.f32 %v2708_v56, %v1149_v23 }
 0x16f   :  { %v2802_v46 = vadd.f32 %v1436_v13, %v1391_v27  ;;  %v2804_v44 = vadd.f32 %v1449_v5, %v1392_v10  ;;  %v1405_v5 = vadd.f32 %v1293_v9, %v1277_v3  ;;  %v1418_v59 = vadd.f32 %v1294_v19, %v1278_v28 }
 0x170   :  { %v836_v50 = vpop.f32.mrf.mxu2  ;;  %v865_v63 = vpop.f32.mrf.mxu3  ;;  %v1165_v17 = vmax.f32 %v670_v14, 0.0 }
 0x171   :  { %v780_v29 = vpop.f32.mrf.mxu0  ;;  %v809_v45 = vpop.f32.mrf.mxu1  ;;  %v837_v21 = vadd.f32 %v836_v50, %v2652_v16  ;;  %v866_v36 = vadd.f32 %v865_v63, %v2652_v16  ;;  %v1406_v28 = vadd.f32 %v1405_v5, %v1309_v53  ;;  %v1419_v48 = vadd.f32 %v1418_v59, %v1310_v57 }
 0x172   :  { %v781_v58 = vadd.f32 %v780_v29, %v2674_v20  ;;  %v810_v13 = vadd.f32 %v809_v45, %v2674_v20  ;;  %v1166_v29 = vmax.f32 %v699_v52, 0.0  ;;  %v673_v59 = vadd.f32 %v2716_v61, %v2682_v34 }
 0x173   :  { %v1123_v27 = vmax.f32 %v837_v21, 0.0  ;;  %v1124_v9 = vmax.f32 %v866_v36, 0.0 }
 0x174   :  { %v1137_v41 = vmax.f32 %v781_v58, 0.0  ;;  %v1138_v6 = vmax.f32 %v810_v13, 0.0  ;;  %v1326_v14 = vmul.f32 %v2722_v32, %v1166_v29 }
 0x175   :  { %v1283_v13 = vmul.f32 %v2678_v54, %v1123_v27  ;;  %v1284_v21 = vmul.f32 %v2678_v54, %v1124_v9 }
 0x176   :  { %v1297_v35 = vmul.f32 %v2688_v55, %v1137_v41  ;;  %v1298_v60 = vmul.f32 %v2688_v55, %v1138_v6  ;;  %v702_v6 = vadd.f32 %v2718_v62, %v2682_v34  ;;  %v1420_v9 = vadd.f32 %v1419_v48, %v1326_v14 }
 0x178   :  { %v1457_v10 = vadd.f32 %v1297_v35, %v1281_v24  ;;  %v1470_v40 = vadd.f32 %v1298_v60, %v1282_v1  ;;  %v838_v31 = vpop.f32.mrf.mxu2  ;;  %v867_v38 = vpop.f32.mrf.mxu3  ;;  %v1325_v60 = vmul.f32 %v2722_v32, %v1165_v17 }
 0x179   :  { %v839_v19 = vadd.f32 %v838_v31, %v2674_v20  ;;  %v868_v50 = vadd.f32 %v867_v38, %v2674_v20  ;;  %v783_v63 = vpop.f32.mrf.mxu0  ;;  %v812_v3 = vpop.f32.mrf.mxu1 }
 0x17a   :  { %v784_v12 = vadd.f32 %v783_v63, %v2668_v7  ;;  %v813_v30 = vadd.f32 %v812_v3, %v2668_v7  ;;  %v1407_v38 = vadd.f32 %v1406_v28, %v1325_v60  ;;  %v1181_v63 = vmax.f32 %v673_v59, 0.0 }
 0x17b   :  { %v1139_v45 = vmax.f32 %v839_v19, 0.0  ;;  %v1140_v58 = vmax.f32 %v868_v50, 0.0  ;;  %1769 = vmatmul.msk.bf16.gmra.mxu0 %vm640_vm0, %v2407_v47  ;;  %v1182_v3 = vmax.f32 %v702_v6, 0.0  ;;  %v704_v28 = vadd.f32 %v2736_v49, %v2712_v26 }
 0x17c   :  { %v1153_v23 = vmax.f32 %v784_v12, 0.0  ;;  %v1154_v51 = vmax.f32 %v813_v30, 0.0  ;;  %1773 = vmatmul.msk.bf16.gmra.mxu1 %vm640_vm0, %v2407_v47 }
 0x17d   :  { %v1299_v41 = vmul.f32 %v2688_v55, %v1139_v45  ;;  %v1300_v5 = vmul.f32 %v2688_v55, %v1140_v58  ;;  %1777 = vmatmul.msk.bf16.gmra.mxu2 %vm640_vm0, %v2407_v47  ;;  %1781 = vmatmul.msk.bf16.gmra.mxu3 %vm640_vm0, %v2407_v47  ;;  %v675_v45 = vadd.f32 %v2734_v39, %v2712_v26 }
 0x17e   :  { %v1313_v36 = vmul.f32 %v2708_v56, %v1153_v23  ;;  %v1314_v24 = vmul.f32 %v2708_v56, %v1154_v51  ;;  %v1341_v51 = vmul.f32 %v2740_v42, %v1181_v63 }
 0x17f   :  { %v1483_v1 = vadd.f32 %v1299_v41, %v1283_v13  ;;  %v1496_v35 = vadd.f32 %v1300_v5, %v1284_v21  ;;  %v1342_v21 = vmul.f32 %v2740_v42, %v1182_v3 }
 0x180   :  { %v1458_v52 = vadd.f32 %v1457_v10, %v1313_v36  ;;  %v1471_v53 = vadd.f32 %v1470_v40, %v1314_v24  ;;  %v841_v57 = vpop.f32.mrf.mxu2  ;;  %v870_v47 = vpop.f32.mrf.mxu3  ;;  %v1408_v60 = vadd.f32 %v1407_v38, %v1341_v51  ;;  %v678_v38 = vadd.f32 %v2746_v43, %v2738_v4 }
 0x181   :  { %v842_v27 = vadd.f32 %v841_v57, %v2668_v7  ;;  %v871_v61 = vadd.f32 %v870_v47, %v2668_v7  ;;  %v785_v31 = vpop.f32.mrf.mxu0  ;;  %v814_v62 = vpop.f32.mrf.mxu1  ;;  %v1421_v14 = vadd.f32 %v1420_v9, %v1342_v21  ;;  %v1198_v47 = vmax.f32 %v704_v28, 0.0 }
 0x182   :  { %v786_v19 = vadd.f32 %v785_v31, %v2662_v11  ;;  %v815_v50 = vadd.f32 %v814_v62, %v2662_v11  ;;  %v707_v9 = vadd.f32 %v2748_v8, %v2738_v4 }
 0x183   :  { %v1155_v12 = vmax.f32 %v842_v27, 0.0  ;;  %v1156_v30 = vmax.f32 %v871_v61, 0.0 }
 0x184   :  { %v1169_v10 = vmax.f32 %v786_v19, 0.0  ;;  %v1170_v40 = vmax.f32 %v815_v50, 0.0  ;;  %v1214_v51 = vmax.f32 %v707_v9, 0.0 }
 0x185   :  { %v1315_v17 = vmul.f32 %v2708_v56, %v1155_v12  ;;  %v1316_v29 = vmul.f32 %v2708_v56, %v1156_v30  ;;  %v1358_v30 = vmul.f32 %v2752_v0, %v1198_v47 }
 0x186   :  { %v1329_v48 = vmul.f32 %v2722_v32, %v1169_v10  ;;  %v1330_v58 = vmul.f32 %v2722_v32, %v1170_v40 }
 0x187   :  { %v1484_v13 = vadd.f32 %v1483_v1, %v1315_v17  ;;  %v1497_v23 = vadd.f32 %v1496_v35, %v1316_v29  ;;  %v1197_v35 = vmax.f32 %v675_v45, 0.0 }
 0x188   :  { %v1459_v41 = vadd.f32 %v1458_v52, %v1329_v48  ;;  %v1472_v5 = vadd.f32 %v1471_v53, %v1330_v58  ;;  %v843_v59 = vpop.f32.mrf.mxu2  ;;  %v872_v6 = vpop.f32.mrf.mxu3  ;;  %v1422_v48 = vadd.f32 %v1421_v14, %v1358_v30 }
 0x189   :  { %v844_v36 = vadd.f32 %v843_v59, %v2662_v11  ;;  %v873_v39 = vadd.f32 %v872_v6, %v2662_v11  ;;  %v788_v24 = vpop.f32.mrf.mxu0  ;;  %v817_v49 = vpop.f32.mrf.mxu1  ;;  %v1357_v12 = vmul.f32 %v2752_v0, %v1197_v35  ;;  %v1374_v35 = vmul.f32 %v2770_v25, %v1214_v51 }
 0x18a   :  { %v789_v57 = vadd.f32 %v788_v24, %v2682_v34  ;;  %v818_v1 = vadd.f32 %v817_v49, %v2682_v34  ;;  %v709_v24 = vadd.f32 %v2766_v22, %v2768_v33 }
 0x18b   :  { %v1171_v27 = vmax.f32 %v844_v36, 0.0  ;;  %v1172_v61 = vmax.f32 %v873_v39, 0.0  ;;  %1770 = vmatmul.msk.bf16.gmra.mxu0 %vm640_vm0, %v2471_v2  ;;  %v1409_v28 = vadd.f32 %v1408_v60, %v1357_v12  ;;  %v680_v39 = vadd.f32 %v2764_v37, %v2768_v33 }
 0x18c   :  { %v1185_v52 = vmax.f32 %v789_v57, 0.0  ;;  %v1186_v53 = vmax.f32 %v818_v1, 0.0  ;;  %1774 = vmatmul.msk.bf16.gmra.mxu1 %vm640_vm0, %v2471_v2 }
 0x18d   :  { %v1331_v31 = vmul.f32 %v2722_v32, %v1171_v27  ;;  %v1332_v62 = vmul.f32 %v2722_v32, %v1172_v61  ;;  %1778 = vmatmul.msk.bf16.gmra.mxu2 %vm640_vm0, %v2471_v2  ;;  %1782 = vmatmul.msk.bf16.gmra.mxu3 %vm640_vm0, %v2471_v2 }
 0x18e   :  { %v1345_v19 = vmul.f32 %v2740_v42, %v1185_v52  ;;  %v1346_v50 = vmul.f32 %v2740_v42, %v1186_v53 }
 0x18f   :  { %v1485_v63 = vadd.f32 %v1484_v13, %v1331_v31  ;;  %v1498_v3 = vadd.f32 %v1497_v23, %v1332_v62  ;;  %v1213_v23 = vmax.f32 %v678_v38, 0.0  ;;  %v1423_v38 = vadd.f32 %v1422_v48, %v1374_v35 }
 0x190   :  { %v1460_v10 = vadd.f32 %v1459_v41, %v1345_v19  ;;  %v1473_v40 = vadd.f32 %v1472_v5, %v1346_v50  ;;  %v846_v17 = vpop.f32.mrf.mxu2  ;;  %v875_v2 = vpop.f32.mrf.mxu3  ;;  %v1229_v50 = vmax.f32 %v680_v39, 0.0 }
 0x191   :  { %v847_v29 = vadd.f32 %v846_v17, %v2682_v34  ;;  %v876_v43 = vadd.f32 %v875_v2, %v2682_v34  ;;  %v790_v45 = vpop.f32.mrf.mxu0  ;;  %v819_v8 = vpop.f32.mrf.mxu1  ;;  %v1373_v1 = vmul.f32 %v2770_v25, %v1213_v23  ;;  %v1438_v2 = vrot.slane %v2802_v46, 4 }
 0x192   :  { %v791_v58 = vadd.f32 %v790_v45, %v2712_v26  ;;  %v820_v13 = vadd.f32 %v819_v8, %v2712_v26 }
 0x193   :  { %v1187_v21 = vmax.f32 %v847_v29, 0.0  ;;  %v1188_v59 = vmax.f32 %v876_v43, 0.0  ;;  %v1410_v62 = vadd.f32 %v1409_v28, %v1373_v1  ;;  %v1389_v28 = vmul.f32 %v2786_v18, %v1229_v50 }
 0x194   :  { %v1201_v41 = vmax.f32 %v791_v58, 0.0  ;;  %v1202_v5 = vmax.f32 %v820_v13, 0.0  ;;  %v1451_v58 = vrot.slane %v2804_v44, 4  ;;  %v1439_v39 = vadd.f32 %v1438_v2, %v2802_v46 }
 0x195   :  { %v1347_v6 = vmul.f32 %v2740_v42, %v1187_v21  ;;  %v1348_v36 = vmul.f32 %v2740_v42, %v1188_v59 }
 0x196   :  { %v1361_v49 = vmul.f32 %v2752_v0, %v1201_v41  ;;  %v1362_v60 = vmul.f32 %v2752_v0, %v1202_v5 }
 0x197   :  { %v1486_v14 = vadd.f32 %v1485_v63, %v1347_v6  ;;  %v1499_v57 = vadd.f32 %v1498_v3, %v1348_v36  ;;  %v1230_v63 = vmax.f32 %v709_v24, 0.0  ;;  %v1411_v6 = vadd.f32 %v1410_v62, %v1389_v28 }
 0x198   :  { %v1461_v47 = vadd.f32 %v1460_v10, %v1361_v49  ;;  %v1474_v27 = vadd.f32 %v1473_v40, %v1362_v60  ;;  %v848_v61 = vpop.f32.mrf.mxu2  ;;  %v877_v52 = vpop.f32.mrf.mxu3 }
 0x199   :  { %v849_v53 = vadd.f32 %v848_v61, %v2712_v26  ;;  %v878_v37 = vadd.f32 %v877_v52, %v2712_v26  ;;  %v793_v31 = vpop.f32.mrf.mxu0  ;;  %v822_v22 = vpop.f32.mrf.mxu1  ;;  %v1390_v48 = vmul.f32 %v2786_v18, %v1230_v63  ;;  %v1412_v60 = vrot.slane %v1411_v6, 4 }
 0x19a   :  { %v794_v9 = vadd.f32 %v793_v31, %v2738_v4  ;;  %v823_v19 = vadd.f32 %v822_v22, %v2738_v4 }
 0x19b   :  { %v1203_v3 = vmax.f32 %v849_v53, 0.0  ;;  %v1204_v12 = vmax.f32 %v878_v37, 0.0  ;;  %1771 = vmatmul.msk.bf16.gmra.mxu0 %vm640_vm0, %v2505_v15  ;;  %v1424_v36 = vadd.f32 %v1423_v38, %v1390_v48  ;;  %v1413_v53 = vadd.f32 %v1412_v60, %v1411_v6 }
 0x19c   :  { %v1217_v30 = vmax.f32 %v794_v9, 0.0  ;;  %v1218_v10 = vmax.f32 %v823_v19, 0.0  ;;  %1775 = vmatmul.msk.bf16.gmra.mxu1 %vm640_vm0, %v2505_v15 }
 0x19d   :  { %v1363_v40 = vmul.f32 %v2752_v0, %v1203_v3  ;;  %v1364_v17 = vmul.f32 %v2752_v0, %v1204_v12  ;;  %1779 = vmatmul.msk.bf16.gmra.mxu2 %vm640_vm0, %v2505_v15  ;;  %1783 = vmatmul.msk.bf16.gmra.mxu3 %vm640_vm0, %v2505_v15  ;;  %v1414_v19 = vrot.slane %v1413_v53, 2 }
 0x19e   :  { %v1377_v29 = vmul.f32 %v2770_v25, %v1217_v30  ;;  %v1378_v43 = vmul.f32 %v2770_v25, %v1218_v10 }
 0x19f   :  { %v1487_v45 = vadd.f32 %v1486_v14, %v1363_v40  ;;  %v1500_v8 = vadd.f32 %v1499_v57, %v1364_v17  ;;  %v1425_v14 = vrot.slane %v1424_v36, 4  ;;  %v1452_v57 = vadd.f32 %v1451_v58, %v2804_v44 }
 0x1a0   :  { %v2918_v13 = vadd.f32 %v1461_v47, %v1377_v29  ;;  %v2920_v23 = vadd.f32 %v1474_v27, %v1378_v43  ;;  %v851_v51 = vpop.f32.mrf.mxu2  ;;  %v880_v15 = vpop.f32.mrf.mxu3  ;;  %v1440_v27 = vrot.slane %v1439_v39, 2  ;;  %v1415_v10 = vadd.f32 %v1414_v19, %v1413_v53 }
 0x1a1   :  { %v852_v21 = vadd.f32 %v851_v51, %v2738_v4  ;;  %v881_v59 = vadd.f32 %v880_v15, %v2738_v4  ;;  %v2924_v41 = vpop.f32.mrf.mxu0  ;;  %v2926_v5 = vpop.f32.mrf.mxu1  ;;  %v1426_v47 = vadd.f32 %v1425_v14, %v1424_v36  ;;  %v1453_v31 = vrot.slane %v1452_v57, 2 }
 0x1a2   :  { %v1441_v9 = vadd.f32 %v1440_v27, %v1439_v39  ;;  %v2944_v15 = vpop.permute.xlu2 %1614 }
 0x1a3   :  { %v1219_v24 = vmax.f32 %v852_v21, 0.0  ;;  %v1220_v49 = vmax.f32 %v881_v59, 0.0  ;;  %v1427_v37 = vrot.slane %v1426_v47, 2  ;;  %v1454_v50 = vadd.f32 %v1453_v31, %v1452_v57 }
 0x1a4   :  { %v1442_v30 = vrot.slane %v1441_v9, 1  ;;  %v1416_v21 = vrot.slane %v1415_v10, 1 }
 0x1a5   :  { %v1379_v1 = vmul.f32 %v2770_v25, %v1219_v24  ;;  %v1380_v35 = vmul.f32 %v2770_v25, %v1220_v49  ;;  %v1428_v44 = vadd.f32 %v1427_v37, %v1426_v47  ;;  %v1455_v40 = vrot.slane %v1454_v50, 1 }
 0x1a6   :  { %v1443_v51 = vadd.f32 %v1442_v30, %v1441_v9 }
 0x1a7   :  { %v2932_v61 = vadd.f32 %v1487_v45, %v1379_v1  ;;  %v2934_v52 = vadd.f32 %v1500_v8, %v1380_v35  ;;  %v1429_v12 = vrot.slane %v1428_v44, 1  ;;  %v1456_v59 = vadd.f32 %v1455_v40, %v1454_v50 }
 0x1a8   :  { %v2936_v46 = vpop.f32.mrf.mxu2  ;;  %v2938_v22 = vpop.f32.mrf.mxu3  ;;  %v1417_v35 = vadd.f32 %v1416_v21, %v1415_v10  ;;  %v1619_v47 = vadd.f32 %v2944_v15, %v1443_v51 }
 0x1a9   :  { %v894_v62 = vpop.f32.mrf.mxu0  ;;  %v923_v38 = vpop.f32.mrf.mxu1  ;;  %v1430_v58 = vadd.f32 %v1429_v12, %v1428_v44 }
 0x1aa   :  { %v895_v63 = vadd.f32 %v894_v62, %v2652_v16  ;;  %v924_v3 = vadd.f32 %v923_v38, %v2652_v16  ;;  %v1620_v62 = vadd.f32 %v2944_v15, %v1456_v59 }
 0x1ab   :  { %v1618_v1 = vadd.f32 %v2944_v15, %v1430_v58 }
 0x1ac   :  { %v1125_v29 = vmax.f32 %v895_v63, 0.0  ;;  %v1126_v8 = vmax.f32 %v924_v3, 0.0 }
 0x1ad   :  { %v1649_v30 = vrot.slane %v1618_v1, 7 }
 0x1ae   :  { %v1285_v39 = vmul.f32 %v2678_v54, %v1125_v29  ;;  %v1286_v60 = vmul.f32 %v2678_v54, %v1126_v8 }
 0x1b0   :  { %v952_v17 = vpop.f32.mrf.mxu2  ;;  %v981_v2 = vpop.f32.mrf.mxu3 }
 0x1b1   :  { %v896_v43 = vpop.f32.mrf.mxu0  ;;  %v925_v45 = vpop.f32.mrf.mxu1  ;;  %v953_v24 = vadd.f32 %v952_v17, %v2652_v16  ;;  %v982_v49 = vadd.f32 %v981_v2, %v2652_v16  ;;  %v1617_v17 = vadd.f32 %v2944_v15, %v1417_v35  ;;  %v1650_v2 = vrot.slane %v1619_v47, 6 }
 0x1b2   :  { %v897_v28 = vadd.f32 %v896_v43, %v2674_v20  ;;  %v926_v48 = vadd.f32 %v925_v45, %v2674_v20  ;;  %v1651_v45 = vrot.slane %v1620_v62, 5 }
 0x1b3   :  { %v1127_v38 = vmax.f32 %v953_v24, 0.0  ;;  %v1128_v44 = vmax.f32 %v982_v49, 0.0  ;;  %v1664_v59 = vsel %vm1663_vm1, %v1617_v17, %v1649_v30 }
 0x1b4   :  { %v1141_v6 = vmax.f32 %v897_v28, 0.0  ;;  %v1142_v36 = vmax.f32 %v926_v48, 0.0 }
 0x1b5   :  { %v1287_v8 = vmul.f32 %v2678_v54, %v1127_v38  ;;  %v1288_v28 = vmul.f32 %v2678_v54, %v1128_v44 }
 0x1b6   :  { %v1301_v14 = vmul.f32 %v2688_v55, %v1141_v6  ;;  %v1302_v57 = vmul.f32 %v2688_v55, %v1142_v36 }
 0x1b8   :  { %v1509_v27 = vadd.f32 %v1301_v14, %v1285_v39  ;;  %v1522_v53 = vadd.f32 %v1302_v57, %v1286_v60  ;;  %v954_v37 = vpop.f32.mrf.mxu2  ;;  %v983_v31 = vpop.f32.mrf.mxu3  ;;  %v1666_v14 = vsel %vm1665_vm2, %v1650_v2, %v1651_v45 }
 0x1b9   :  { %v955_v9 = vadd.f32 %v954_v37, %v2674_v20  ;;  %v984_v19 = vadd.f32 %v983_v31, %v2674_v20  ;;  %v899_v50 = vpop.f32.mrf.mxu0  ;;  %v928_v63 = vpop.f32.mrf.mxu1  ;;  %v2971_v37 = vsel %vm1667_vm3, %v1664_v59, %v1666_v14  ;;  %v854_v59 = vadd.f32 %v2936_v46, %v2768_v33 }
 0x1ba   :  { %v900_v3 = vadd.f32 %v899_v50, %v2668_v7  ;;  %v929_v12 = vadd.f32 %v928_v63, %v2668_v7 }
 0x1bb   :  { %v1143_v10 = vmax.f32 %v955_v9, 0.0  ;;  %v1144_v40 = vmax.f32 %v984_v19, 0.0  ;;  %v1235_v46 = vmax.f32 %v854_v59, 0.0 }
 0x1bc   :  { %v1157_v29 = vmax.f32 %v900_v3, 0.0  ;;  %v1158_v43 = vmax.f32 %v929_v12, 0.0  ;;  %v796_v3 = vadd.f32 %v2924_v41, %v2768_v33  ;;  %v825_v12 = vadd.f32 %v2926_v5, %v2768_v33 }
 0x1bd   :  { %v1303_v48 = vmul.f32 %v2688_v55, %v1143_v10  ;;  %v1304_v58 = vmul.f32 %v2688_v55, %v1144_v40 }
 0x1be   :  { %v1317_v51 = vmul.f32 %v2708_v56, %v1157_v29  ;;  %v1318_v21 = vmul.f32 %v2708_v56, %v1158_v43  ;;  %v1233_v41 = vmax.f32 %v796_v3, 0.0 }
 0x1bf   :  { %v1535_v6 = vadd.f32 %v1303_v48, %v1287_v8  ;;  %v1548_v36 = vadd.f32 %v1304_v58, %v1288_v28 }
 0x1c0   :  { %v1510_v39 = vadd.f32 %v1509_v27, %v1317_v51  ;;  %v1523_v24 = vadd.f32 %v1522_v53, %v1318_v21  ;;  %v957_v49 = vpop.f32.mrf.mxu2  ;;  %v986_v60 = vpop.f32.mrf.mxu3  ;;  %v1234_v51 = vmax.f32 %v825_v12, 0.0 }
 0x1c1   :  { %v958_v57 = vadd.f32 %v957_v49, %v2668_v7  ;;  %v987_v1 = vadd.f32 %v986_v60, %v2668_v7  ;;  %v901_v35 = vpop.f32.mrf.mxu0  ;;  %v930_v47 = vpop.f32.mrf.mxu1 }
 0x1c2   :  { %v902_v31 = vadd.f32 %v901_v35, %v2662_v11  ;;  %v931_v62 = vadd.f32 %v930_v47, %v2662_v11 }
 0x1c3   :  { %v1159_v27 = vmax.f32 %v958_v57, 0.0  ;;  %v1160_v53 = vmax.f32 %v987_v1, 0.0  ;;  %v1393_v57 = vmul.f32 %v2786_v18, %v1233_v41  ;;  %v1394_v1 = vmul.f32 %v2786_v18, %v1234_v51 }
 0x1c4   :  { %v1173_v38 = vmax.f32 %v902_v31, 0.0  ;;  %v1174_v44 = vmax.f32 %v931_v62, 0.0 }
 0x1c5   :  { %v1319_v9 = vmul.f32 %v2708_v56, %v1159_v27  ;;  %v1320_v19 = vmul.f32 %v2708_v56, %v1160_v53  ;;  %v1463_v3 = vadd.f32 %v2918_v13, %v1393_v57  ;;  %v1476_v12 = vadd.f32 %v2920_v23, %v1394_v1 }
 0x1c6   :  { %v1333_v50 = vmul.f32 %v2722_v32, %v1173_v38  ;;  %v1334_v63 = vmul.f32 %v2722_v32, %v1174_v44 }
 0x1c7   :  { %v1536_v30 = vadd.f32 %v1535_v6, %v1319_v9  ;;  %v1549_v10 = vadd.f32 %v1548_v36, %v1320_v19  ;;  %v883_v6 = vadd.f32 %v2938_v22, %v2768_v33  ;;  %v1477_v13 = vrot.slane %v1476_v12, 4 }
 0x1c8   :  { %v1511_v40 = vadd.f32 %v1510_v39, %v1333_v50  ;;  %v1524_v17 = vadd.f32 %v1523_v24, %v1334_v63  ;;  %v959_v2 = vpop.f32.mrf.mxu2  ;;  %v988_v29 = vpop.f32.mrf.mxu3 }
 0x1c9   :  { %v960_v43 = vadd.f32 %v959_v2, %v2662_v11  ;;  %v989_v45 = vadd.f32 %v988_v29, %v2662_v11  ;;  %v904_v8 = vpop.f32.mrf.mxu0  ;;  %v933_v28 = vpop.f32.mrf.mxu1  ;;  %v1236_v31 = vmax.f32 %v883_v6, 0.0  ;;  %v1478_v1 = vadd.f32 %v1477_v13, %v1476_v12 }
 0x1ca   :  { %v905_v48 = vadd.f32 %v904_v8, %v2682_v34  ;;  %v934_v58 = vadd.f32 %v933_v28, %v2682_v34 }
 0x1cb   :  { %v1175_v21 = vmax.f32 %v960_v43, 0.0  ;;  %v1176_v5 = vmax.f32 %v989_v45, 0.0 }
 0x1cc   :  { %v1189_v36 = vmax.f32 %v905_v48, 0.0  ;;  %v1190_v39 = vmax.f32 %v934_v58, 0.0  ;;  %v1464_v48 = vrot.slane %v1463_v3, 4 }
 0x1cd   :  { %v1335_v24 = vmul.f32 %v2722_v32, %v1175_v21  ;;  %v1336_v49 = vmul.f32 %v2722_v32, %v1176_v5 }
 0x1ce   :  { %v1349_v60 = vmul.f32 %v2740_v42, %v1189_v36  ;;  %v1350_v14 = vmul.f32 %v2740_v42, %v1190_v39  ;;  %v1465_v57 = vadd.f32 %v1464_v48, %v1463_v3 }
 0x1cf   :  { %v1537_v35 = vadd.f32 %v1536_v30, %v1335_v24  ;;  %v1550_v47 = vadd.f32 %v1549_v10, %v1336_v49 }
 0x1d0   :  { %v1512_v62 = vadd.f32 %v1511_v40, %v1349_v60  ;;  %v1525_v22 = vadd.f32 %v1524_v17, %v1350_v14  ;;  %v962_v27 = vpop.f32.mrf.mxu2  ;;  %v991_v53 = vpop.f32.mrf.mxu3  ;;  %v1395_v40 = vmul.f32 %v2786_v18, %v1235_v46  ;;  %v1396_v17 = vmul.f32 %v2786_v18, %v1236_v31 }
 0x1d1   :  { %v963_v38 = vadd.f32 %v962_v27, %v2682_v34  ;;  %v992_v44 = vadd.f32 %v991_v53, %v2682_v34  ;;  %v906_v9 = vpop.f32.mrf.mxu0  ;;  %v935_v19 = vpop.f32.mrf.mxu1 }
 0x1d2   :  { %v907_v50 = vadd.f32 %v906_v9, %v2712_v26  ;;  %v936_v63 = vadd.f32 %v935_v19, %v2712_v26  ;;  %v1489_v41 = vadd.f32 %v2932_v61, %v1395_v40  ;;  %v1502_v51 = vadd.f32 %v2934_v52, %v1396_v17 }
 0x1d3   :  { %v1191_v30 = vmax.f32 %v963_v38, 0.0  ;;  %v1192_v10 = vmax.f32 %v992_v44, 0.0  ;;  %v1466_v38 = vrot.slane %v1465_v57, 2  ;;  %v1479_v44 = vrot.slane %v1478_v1, 2 }
 0x1d4   :  { %v1205_v2 = vmax.f32 %v907_v50, 0.0  ;;  %v1206_v29 = vmax.f32 %v936_v63, 0.0  ;;  %v1503_v52 = vrot.slane %v1502_v51, 4 }
 0x1d5   :  { %v1351_v43 = vmul.f32 %v2740_v42, %v1191_v30  ;;  %v1352_v45 = vmul.f32 %v2740_v42, %v1192_v10 }
 0x1d6   :  { %v1365_v8 = vmul.f32 %v2752_v0, %v1205_v2  ;;  %v1366_v28 = vmul.f32 %v2752_v0, %v1206_v29  ;;  %v1504_v63 = vadd.f32 %v1503_v52, %v1502_v51 }
 0x1d7   :  { %v1538_v58 = vadd.f32 %v1537_v35, %v1351_v43  ;;  %v1551_v23 = vadd.f32 %v1550_v47, %v1352_v45  ;;  %v1490_v47 = vrot.slane %v1489_v41, 4 }
 0x1d8   :  { %v1513_v21 = vadd.f32 %v1512_v62, %v1365_v8  ;;  %v1526_v5 = vadd.f32 %v1525_v22, %v1366_v28  ;;  %v964_v59 = vpop.f32.mrf.mxu2  ;;  %v993_v6 = vpop.f32.mrf.mxu3  ;;  %v1467_v8 = vadd.f32 %v1466_v38, %v1465_v57  ;;  %v1480_v28 = vadd.f32 %v1479_v44, %v1478_v1 }
 0x1d9   :  { %v965_v36 = vadd.f32 %v964_v59, %v2712_v26  ;;  %v994_v39 = vadd.f32 %v993_v6, %v2712_v26  ;;  %v909_v24 = vpop.f32.mrf.mxu0  ;;  %v938_v49 = vpop.f32.mrf.mxu1  ;;  %v1491_v50 = vadd.f32 %v1490_v47, %v1489_v41 }
 0x1da   :  { %v910_v60 = vadd.f32 %v909_v24, %v2738_v4  ;;  %v939_v14 = vadd.f32 %v938_v49, %v2738_v4 }
 0x1db   :  { %v1207_v35 = vmax.f32 %v965_v36, 0.0  ;;  %v1208_v61 = vmax.f32 %v994_v39, 0.0  ;;  %v1468_v36 = vrot.slane %v1467_v8, 1  ;;  %v1481_v39 = vrot.slane %v1480_v28, 1 }
 0x1dc   :  { %v1221_v46 = vmax.f32 %v910_v60, 0.0  ;;  %v1222_v31 = vmax.f32 %v939_v14, 0.0 }
 0x1dd   :  { %v1367_v62 = vmul.f32 %v2752_v0, %v1207_v35  ;;  %v1368_v22 = vmul.f32 %v2752_v0, %v1208_v61 }
 0x1de   :  { %v1381_v27 = vmul.f32 %v2770_v25, %v1221_v46  ;;  %v1382_v53 = vmul.f32 %v2770_v25, %v1222_v31 }
 0x1df   :  { %v1539_v9 = vadd.f32 %v1538_v58, %v1367_v62  ;;  %v1552_v19 = vadd.f32 %v1551_v23, %v1368_v22  ;;  %v1492_v58 = vrot.slane %v1491_v50, 2  ;;  %v1505_v23 = vrot.slane %v1504_v63, 2 }
 0x1e0   :  { %v1514_v3 = vadd.f32 %v1513_v21, %v1381_v27  ;;  %v1527_v12 = vadd.f32 %v1526_v5, %v1382_v53  ;;  %v967_v30 = vpop.f32.mrf.mxu2  ;;  %v996_v10 = vpop.f32.mrf.mxu3  ;;  %v1469_v27 = vadd.f32 %v1468_v36, %v1467_v8  ;;  %v1482_v53 = vadd.f32 %v1481_v39, %v1480_v28 }
 0x1e1   :  { %v968_v40 = vadd.f32 %v967_v30, %v2738_v4  ;;  %v997_v17 = vadd.f32 %v996_v10, %v2738_v4  ;;  %v911_v2 = vpop.f32.mrf.mxu0  ;;  %v940_v29 = vpop.f32.mrf.mxu1  ;;  %v1493_v60 = vadd.f32 %v1492_v58, %v1491_v50  ;;  %v1506_v14 = vadd.f32 %v1505_v23, %v1504_v63 }
 0x1e2   :  { %v912_v43 = vadd.f32 %v911_v2, %v2768_v33  ;;  %v941_v45 = vadd.f32 %v940_v29, %v2768_v33 }
 0x1e3   :  { %v1223_v48 = vmax.f32 %v968_v40, 0.0  ;;  %v1224_v13 = vmax.f32 %v997_v17, 0.0  ;;  %v1494_v38 = vrot.slane %v1493_v60, 1  ;;  %v1507_v44 = vrot.slane %v1506_v14, 1 }
 0x1e4   :  { %v1237_v41 = vmax.f32 %v912_v43, 0.0  ;;  %v1238_v51 = vmax.f32 %v941_v45, 0.0 }
 0x1e5   :  { %v1383_v21 = vmul.f32 %v2770_v25, %v1223_v48  ;;  %v1384_v5 = vmul.f32 %v2770_v25, %v1224_v13  ;;  %v1495_v30 = vadd.f32 %v1494_v38, %v1493_v60  ;;  %v1508_v10 = vadd.f32 %v1507_v44, %v1506_v14 }
 0x1e6   :  { %v1397_v59 = vmul.f32 %v2786_v18, %v1237_v41  ;;  %v1398_v6 = vmul.f32 %v2786_v18, %v1238_v51 }
 0x1e7   :  { %v1540_v24 = vadd.f32 %v1539_v9, %v1383_v21  ;;  %v1553_v49 = vadd.f32 %v1552_v19, %v1384_v5  ;;  %v1623_v8 = vadd.f32 %v2944_v15, %v1495_v30  ;;  %v1624_v28 = vadd.f32 %v2944_v15, %v1508_v10 }
 0x1e8   :  { %v1515_v57 = vadd.f32 %v1514_v3, %v1397_v59  ;;  %v1528_v1 = vadd.f32 %v1527_v12, %v1398_v6  ;;  %v969_v35 = vpop.f32.mrf.mxu2  ;;  %v998_v61 = vpop.f32.mrf.mxu3  ;;  %v1621_v3 = vadd.f32 %v2944_v15, %v1469_v27  ;;  %v1622_v12 = vadd.f32 %v2944_v15, %v1482_v53 }
 0x1e9   :  { %v970_v47 = vadd.f32 %v969_v35, %v2768_v33  ;;  %v999_v52 = vadd.f32 %v998_v61, %v2768_v33  ;;  %v1010_v46 = vpop.f32.mrf.mxu0  ;;  %v1039_v31 = vpop.f32.mrf.mxu1  ;;  %v1654_v48 = vrot.slane %v1623_v8, 2  ;;  %v1655_v13 = vrot.slane %v1624_v28, 1 }
 0x1ea   :  { %v1652_v43 = vrot.slane %v1621_v3, 4  ;;  %v1653_v45 = vrot.slane %v1622_v12, 3  ;;  %v1529_v58 = vrot.slane %v1528_v1, 4  ;;  %v1516_v21 = vrot.slane %v1515_v57, 4 }
 0x1eb   :  { %v1239_v62 = vmax.f32 %v970_v47, 0.0  ;;  %v1240_v22 = vmax.f32 %v999_v52, 0.0  ;;  %v1672_v39 = vsel %vm1671_vm5, %v1654_v48, %v1655_v13 }
 0x1ec   :  { %v1670_v51 = vsel %vm1669_vm4, %v1652_v43, %v1653_v45  ;;  %v1530_v36 = vadd.f32 %v1529_v58, %v1528_v1 }
 0x1ed   :  { %v1399_v9 = vmul.f32 %v2786_v18, %v1239_v62  ;;  %v1400_v19 = vmul.f32 %v2786_v18, %v1240_v22  ;;  %v1674_v14 = vsel %vm1673_vm6, %v1670_v51, %v1672_v39 }
 0x1ee   :  { %v1531_v35 = vrot.slane %v1530_v36, 2  ;;  %v1676_v52 = vsel %vm1675_vm7, %v2971_v37, %v1674_v14 }
 0x1ef   :  { %v1541_v50 = vadd.f32 %v1540_v24, %v1399_v9  ;;  %v1554_v63 = vadd.f32 %v1553_v49, %v1400_v19  ;;  %v1517_v24 = vadd.f32 %v1516_v21, %v1515_v57  ;;  %1686 = vst [vmem:[#allocation2] sm:$0xff] %v1676_v52  ;;  %v1011_v57 = vadd.f32 %v1010_v46, %v2652_v16 }
 0x1f0   :  { %v1068_v40 = vpop.f32.mrf.mxu2  ;;  %v1097_v17 = vpop.f32.mrf.mxu3  ;;  %v1532_v38 = vadd.f32 %v1531_v35, %v1530_v36  ;;  %v1040_v9 = vadd.f32 %v1039_v31, %v2652_v16 }
 0x1f1   :  { %v1012_v2 = vpop.f32.mrf.mxu0  ;;  %v1041_v29 = vpop.f32.mrf.mxu1  ;;  %v1542_v6 = vrot.slane %v1541_v50, 4  ;;  %v1555_v60 = vrot.slane %v1554_v63, 4  ;;  %v1518_v62 = vrot.slane %v1517_v24, 2  ;;  %v1129_v12 = vmax.f32 %v1011_v57, 0.0 }
 0x1f2   :  { %v1533_v3 = vrot.slane %v1532_v38, 1  ;;  %v1013_v30 = vadd.f32 %v1012_v2, %v2674_v20  ;;  %v1042_v37 = vadd.f32 %v1041_v29, %v2674_v20  ;;  %v1130_v8 = vmax.f32 %v1040_v9, 0.0 }
 0x1f3   :  { %v1543_v49 = vadd.f32 %v1542_v6, %v1541_v50  ;;  %v1556_v1 = vadd.f32 %v1555_v60, %v1554_v63  ;;  %v1519_v44 = vadd.f32 %v1518_v62, %v1517_v24  ;;  %v1069_v63 = vadd.f32 %v1068_v40, %v2652_v16 }
 0x1f4   :  { %v1098_v46 = vadd.f32 %v1097_v17, %v2652_v16  ;;  %v1534_v29 = vadd.f32 %v1533_v3, %v1532_v38  ;;  %v1289_v21 = vmul.f32 %v2678_v54, %v1129_v12  ;;  %v1145_v6 = vmax.f32 %v1013_v30, 0.0 }
 0x1f5   :  { %v1544_v53 = vrot.slane %v1543_v49, 2  ;;  %v1557_v50 = vrot.slane %v1556_v1, 2  ;;  %v1520_v45 = vrot.slane %v1519_v44, 1  ;;  %v1146_v36 = vmax.f32 %v1042_v37, 0.0 }
 0x1f6   :  { %v1290_v40 = vmul.f32 %v2678_v54, %v1130_v8  ;;  %v1131_v24 = vmax.f32 %v1069_v63, 0.0  ;;  %v1132_v16 = vmax.f32 %v1098_v46, 0.0  ;;  %v1305_v52 = vmul.f32 %v2688_v55, %v1145_v6 }
 0x1f7   :  { %v1545_v19 = vadd.f32 %v1544_v53, %v1543_v49  ;;  %v1558_v13 = vadd.f32 %v1557_v50, %v1556_v1  ;;  %v1521_v39 = vadd.f32 %v1520_v45, %v1519_v44  ;;  %v1306_v62 = vmul.f32 %v2688_v55, %v1146_v36 }
 0x1f8   :  { %v1070_v23 = vpop.f32.mrf.mxu2  ;;  %v1099_v41 = vpop.f32.mrf.mxu3  ;;  %v1561_v8 = vadd.f32 %v1305_v52, %v1289_v21 }
 0x1f9   :  { %v1015_v5 = vpop.f32.mrf.mxu0  ;;  %v1044_v59 = vpop.f32.mrf.mxu1  ;;  %v1546_v31 = vrot.slane %v1545_v19, 1  ;;  %v1071_v58 = vadd.f32 %v1070_v23, %v2674_v20  ;;  %v1100_v51 = vadd.f32 %v1099_v41, %v2674_v20  ;;  %v1559_v49 = vrot.slane %v1558_v13, 1 }
 0x1fa   :  { %v1016_v2 = vadd.f32 %v1015_v5, %v2668_v7  ;;  %v1045_v14 = vadd.f32 %v1044_v59, %v2668_v7  ;;  %v3057_v5 = vadd.f32 %v2944_v15, %v1534_v29  ;;  %v3063_v57 = vadd.f32 %v2944_v15, %v1521_v39 }
 0x1fb   :  { %v1547_v17 = vadd.f32 %v1546_v31, %v1545_v19  ;;  %v1147_v60 = vmax.f32 %v1071_v58, 0.0  ;;  %v1148_v23 = vmax.f32 %v1100_v51, 0.0  ;;  %v1291_v59 = vmul.f32 %v2678_v54, %v1131_v24 }
 0x1fc   :  { %v1161_v35 = vmax.f32 %v1016_v2, 0.0  ;;  %v1560_v19 = vadd.f32 %v1559_v49, %v1558_v13  ;;  %v1162_v3 = vmax.f32 %v1045_v14, 0.0  ;;  %v1656_v45 = vrot.slane %v3057_v5, 7 }
 0x1fd   :  { %v1627_v9 = vadd.f32 %v2944_v15, %v1547_v17  ;;  %v1307_v50 = vmul.f32 %v2688_v55, %v1147_v60 }
 0x1fe   :  { %v1321_v12 = vmul.f32 %v2708_v56, %v1161_v35  ;;  %v1628_v51 = vadd.f32 %v2944_v15, %v1560_v19  ;;  %v1322_v2 = vmul.f32 %v2708_v56, %v1162_v3 }
 0x1ff   :  { %v1657_v58 = vrot.slane %v1627_v9, 6 }
 0x200   :  { %v1073_v61 = vpop.f32.mrf.mxu2  ;;  %v1102_v47 = vpop.f32.mrf.mxu3  ;;  %v1562_v6 = vadd.f32 %v1561_v8, %v1321_v12 }
 0x201   :  { %v1017_v22 = vpop.f32.mrf.mxu0  ;;  %v1046_v27 = vpop.f32.mrf.mxu1  ;;  %v1074_v20 = vadd.f32 %v1073_v61, %v2668_v7  ;;  %v1103_v41 = vadd.f32 %v1102_v47, %v2668_v7  ;;  %v1292_v61 = vmul.f32 %v2678_v54, %v1132_v16  ;;  %v1574_v54 = vadd.f32 %v1306_v62, %v1290_v40 }
 0x202   :  { %v1018_v53 = vadd.f32 %v1017_v22, %v2662_v11  ;;  %v1047_v7 = vadd.f32 %v1046_v27, %v2662_v11  ;;  %v1308_v22 = vmul.f32 %v2688_v55, %v1148_v23  ;;  %v1587_v55 = vadd.f32 %v1307_v50, %v1291_v59 }
 0x203   :  { %v1163_v30 = vmax.f32 %v1074_v20, 0.0  ;;  %v1164_v37 = vmax.f32 %v1103_v41, 0.0  ;;  %v1575_v41 = vadd.f32 %v1574_v54, %v1322_v2 }
 0x204   :  { %v1177_v63 = vmax.f32 %v1018_v53, 0.0  ;;  %v1178_v27 = vmax.f32 %v1047_v7, 0.0  ;;  %v1600_v29 = vadd.f32 %v1308_v22, %v1292_v61  ;;  %v1677_v22 = vsel %vm1663_vm1, %v3063_v57, %v1656_v45 }
 0x205   :  { %v1323_v36 = vmul.f32 %v2708_v56, %v1163_v30  ;;  %v1324_v21 = vmul.f32 %v2708_v56, %v1164_v37 }
 0x206   :  { %v1337_v39 = vmul.f32 %v2722_v32, %v1177_v63  ;;  %v1338_v16 = vmul.f32 %v2722_v32, %v1178_v27 }
 0x207   :  { %v1588_v5 = vadd.f32 %v1587_v55, %v1323_v36  ;;  %v1601_v52 = vadd.f32 %v1600_v29, %v1324_v21 }
 0x208   :  { %v1075_v10 = vpop.f32.mrf.mxu2  ;;  %v3044_v43 = vpop.f32.mrf.mxu3  ;;  %v1563_v62 = vadd.f32 %v1562_v6, %v1337_v39  ;;  %v1576_v7 = vadd.f32 %v1575_v41, %v1338_v16 }
 0x209   :  { %v1020_v28 = vpop.f32.mrf.mxu0  ;;  %v1049_v48 = vpop.f32.mrf.mxu1  ;;  %v1076_v46 = vadd.f32 %v1075_v10, %v2662_v11  ;;  %v1105_v10 = vadd.f32 %v3044_v43, %v2662_v11  ;;  %v1658_v43 = vrot.slane %v1628_v51, 5 }
 0x20a   :  { %v1021_v31 = vadd.f32 %v1020_v28, %v2682_v34  ;;  %v1050_v13 = vadd.f32 %v1049_v48, %v2682_v34 }
 0x20b   :  { %v1179_v17 = vmax.f32 %v1076_v46, 0.0  ;;  %v1180_v53 = vmax.f32 %v1105_v10, 0.0  ;;  %v1678_v12 = vsel %vm1665_vm2, %v1657_v58, %v1658_v43 }
 0x20c   :  { %v1193_v49 = vmax.f32 %v1021_v31, 0.0  ;;  %v1194_v60 = vmax.f32 %v1050_v13, 0.0  ;;  %v3102_v27 = vsel %vm1667_vm3, %v1677_v22, %v1678_v12 }
 0x20d   :  { %v1340_v30 = vmul.f32 %v2722_v32, %v1180_v53 }
 0x210   :  { %v1078_v1 = vpop.f32.mrf.mxu2  ;;  %v1107_v38 = vpop.f32.mrf.mxu3 }
 0x211   :  { %v1022_v47 = vpop.f32.mrf.mxu0  ;;  %v1051_v44 = vpop.f32.mrf.mxu1  ;;  %v1079_v56 = vadd.f32 %v1078_v1, %v2682_v34  ;;  %v1108_v35 = vadd.f32 %v1107_v38, %v2682_v34  ;;  %v1354_v1 = vmul.f32 %v2740_v42, %v1194_v60 }
 0x212   :  { %v1023_v28 = vadd.f32 %v1022_v47, %v2712_v26  ;;  %v1052_v48 = vadd.f32 %v1051_v44, %v2712_v26  ;;  %v1339_v47 = vmul.f32 %v2722_v32, %v1179_v17  ;;  %v1353_v44 = vmul.f32 %v2740_v42, %v1193_v49 }
 0x213   :  { %v1195_v34 = vmax.f32 %v1079_v56, 0.0  ;;  %v1196_v38 = vmax.f32 %v1108_v35, 0.0  ;;  %v1577_v31 = vadd.f32 %v1576_v7, %v1354_v1 }
 0x214   :  { %v1209_v59 = vmax.f32 %v1023_v28, 0.0  ;;  %v1210_v61 = vmax.f32 %v1052_v48, 0.0  ;;  %v1564_v46 = vadd.f32 %v1563_v62, %v1353_v44  ;;  %v1589_v28 = vadd.f32 %v1588_v5, %v1339_v47 }
 0x215   :  { %v1355_v2 = vmul.f32 %v2740_v42, %v1195_v34  ;;  %v1356_v29 = vmul.f32 %v2740_v42, %v1196_v38  ;;  %v1602_v48 = vadd.f32 %v1601_v52, %v1340_v30 }
 0x216   :  { %v1369_v37 = vmul.f32 %v2752_v0, %v1209_v59  ;;  %v1370_v8 = vmul.f32 %v2752_v0, %v1210_v61 }
 0x217   :  { %v1603_v56 = vadd.f32 %v1602_v48, %v1356_v29 }
 0x218   :  { %v1080_v40 = vpop.f32.mrf.mxu2  ;;  %v1109_v24 = vpop.f32.mrf.mxu3  ;;  %v1565_v21 = vadd.f32 %v1564_v46, %v1369_v37  ;;  %v1578_v39 = vadd.f32 %v1577_v31, %v1370_v8 }
 0x219   :  { %v1025_v14 = vpop.f32.mrf.mxu0  ;;  %v1054_v23 = vpop.f32.mrf.mxu1  ;;  %v1081_v50 = vadd.f32 %v1080_v40, %v2712_v26  ;;  %v1110_v3 = vadd.f32 %v1109_v24, %v2712_v26 }
 0x21a   :  { %v1026_v20 = vadd.f32 %v1025_v14, %v2738_v4  ;;  %v1055_v11 = vadd.f32 %v1054_v23, %v2738_v4  ;;  %v1590_v23 = vadd.f32 %v1589_v28, %v1355_v2 }
 0x21b   :  { %v1211_v6 = vmax.f32 %v1081_v50, 0.0  ;;  %v1212_v36 = vmax.f32 %v1110_v3, 0.0 }
 0x21c   :  { %v1225_v9 = vmax.f32 %v1026_v20, 0.0  ;;  %v1226_v19 = vmax.f32 %v1055_v11, 0.0 }
 0x21d   :  { %v1371_v14 = vmul.f32 %v2752_v0, %v1211_v6  ;;  %v1372_v42 = vmul.f32 %v2752_v0, %v1212_v36 }
 0x21e   :  { %v1385_v58 = vmul.f32 %v2770_v25, %v1225_v9  ;;  %v1386_v32 = vmul.f32 %v2770_v25, %v1226_v19 }
 0x21f   :  { %v1591_v61 = vadd.f32 %v1590_v23, %v1371_v14  ;;  %v1604_v7 = vadd.f32 %v1603_v56, %v1372_v42 }
 0x220   :  { %v1083_v54 = vpop.f32.mrf.mxu2  ;;  %v1112_v63 = vpop.f32.mrf.mxu3  ;;  %v1566_v16 = vadd.f32 %v1565_v21, %v1385_v58  ;;  %v1579_v17 = vadd.f32 %v1578_v39, %v1386_v32 }
 0x221   :  { %v1084_v26 = vadd.f32 %v1083_v54, %v2738_v4  ;;  %v1113_v13 = vadd.f32 %v1112_v63, %v2738_v4  ;;  %v1027_v57 = vpop.f32.mrf.mxu0  ;;  %v1056_v45 = vpop.f32.mrf.mxu1 }
 0x222   :  { %v1028_v51 = vadd.f32 %v1027_v57, %v2768_v33  ;;  %v1057_v55 = vadd.f32 %v1056_v45, %v2768_v33 }
 0x223   :  { %v1227_v40 = vmax.f32 %v1084_v26, 0.0  ;;  %v1228_v24 = vmax.f32 %v1113_v13, 0.0 }
 0x224   :  { %v1241_v10 = vmax.f32 %v1028_v51, 0.0  ;;  %v1242_v4 = vmax.f32 %v1057_v55, 0.0 }
 0x225   :  { %v1387_v41 = vmul.f32 %v2770_v25, %v1227_v40  ;;  %v1388_v5 = vmul.f32 %v2770_v25, %v1228_v24 }
 0x226   :  { %v1401_v49 = vmul.f32 %v2786_v18, %v1241_v10  ;;  %v1402_v60 = vmul.f32 %v2786_v18, %v1242_v4 }
 0x227   :  { %v1592_v34 = vadd.f32 %v1591_v61, %v1387_v41  ;;  %v1605_v38 = vadd.f32 %v1604_v7, %v1388_v5 }
 0x228   :  { %v1567_v35 = vadd.f32 %v1566_v16, %v1401_v49  ;;  %v1580_v20 = vadd.f32 %v1579_v17, %v1402_v60  ;;  %v1085_v11 = vpop.f32.mrf.mxu2  ;;  %v1114_v43 = vpop.f32.mrf.mxu3 }
 0x229   :  { %v1086_v52 = vadd.f32 %v1085_v11, %v2768_v33  ;;  %v1115_v62 = vadd.f32 %v1114_v43, %v2768_v33 }
 0x22a   :  { %v1568_v53 = vrot.slane %v1567_v35, 4  ;;  %v1581_v59 = vrot.slane %v1580_v20, 4 }
 0x22b   :  { %v1243_v47 = vmax.f32 %v1086_v52, 0.0  ;;  %v1244_v0 = vmax.f32 %v1115_v62, 0.0 }
 0x22c   :  { %v1569_v44 = vadd.f32 %v1568_v53, %v1567_v35  ;;  %v1582_v1 = vadd.f32 %v1581_v59, %v1580_v20 }
 0x22d   :  { %v1403_v9 = vmul.f32 %v2786_v18, %v1243_v47  ;;  %v1404_v19 = vmul.f32 %v2786_v18, %v1244_v0 }
 0x22e   :  { %v1570_v50 = vrot.slane %v1569_v44, 2  ;;  %v1583_v25 = vrot.slane %v1582_v1, 2 }
 0x22f   :  { %v1593_v3 = vadd.f32 %v1592_v34, %v1403_v9  ;;  %v1606_v22 = vadd.f32 %v1605_v38, %v1404_v19 }
 0x230   :  { %v1571_v12 = vadd.f32 %v1570_v50, %v1569_v44  ;;  %v1584_v33 = vadd.f32 %v1583_v25, %v1582_v1 }
 0x231   :  { %v1594_v30 = vrot.slane %v1593_v3, 4  ;;  %v1607_v37 = vrot.slane %v1606_v22, 4 }
 0x232   :  { %v1572_v8 = vrot.slane %v1571_v12, 1  ;;  %v1585_v54 = vrot.slane %v1584_v33, 1 }
 0x233   :  { %v1595_v63 = vadd.f32 %v1594_v30, %v1593_v3  ;;  %v1608_v46 = vadd.f32 %v1607_v37, %v1606_v22 }
 0x234   :  { %v1573_v31 = vadd.f32 %v1572_v8, %v1571_v12  ;;  %v1586_v26 = vadd.f32 %v1585_v54, %v1584_v33 }
 0x235   :  { %v1596_v13 = vrot.slane %v1595_v63, 2  ;;  %v1609_v57 = vrot.slane %v1608_v46, 2 }
 0x236   :  { %v1629_v18 = vadd.f32 %v2944_v15, %v1573_v31  ;;  %v1630_v32 = vadd.f32 %v2944_v15, %v1586_v26 }
 0x237   :  { %v1597_v45 = vadd.f32 %v1596_v13, %v1595_v63  ;;  %v1610_v58 = vadd.f32 %v1609_v57, %v1608_v46 }
 0x238   :  { %v1659_v6 = vrot.slane %v1629_v18, 4  ;;  %v1660_v36 = vrot.slane %v1630_v32, 3 }
 0x239   :  { %v1598_v51 = vrot.slane %v1597_v45, 1  ;;  %v1611_v55 = vrot.slane %v1610_v58, 1 }
 0x23a   :  { %v1680_v28 = vsel %vm1669_vm4, %v1659_v6, %v1660_v36 }
 0x23b   :  { %v1599_v2 = vadd.f32 %v1598_v51, %v1597_v45  ;;  %v1612_v29 = vadd.f32 %v1611_v55, %v1610_v58 }
 0x23d   :  { %v1631_v21 = vadd.f32 %v2944_v15, %v1599_v2  ;;  %v1632_v39 = vadd.f32 %v2944_v15, %v1612_v29 }
 0x23f   :  { %v1661_v10 = vrot.slane %v1631_v21, 2  ;;  %v1662_v4 = vrot.slane %v1632_v39, 1 }
 0x241   :  { %v1681_v48 = vsel %vm1671_vm5, %v1661_v10, %v1662_v4 }
 0x242   :  { %v1682_v40 = vsel %vm1673_vm6, %v1680_v28, %v1681_v48 }
 0x243   :  { %v1683_v24 = vsel %vm1675_vm7, %v3102_v27, %v1682_v40 }
 0x244   :  { %1687 = vst [vmem:[#allocation2 + $0x8] sm:$0xff] %v1683_v24 }
 0x245   :  { %1698 = dma.vmem_to_hbm [thread:$0]  %s1694_s15, 256, %s1696_s18, [#allocation3]  }
 0x246   :  { %1840 = dma.done.wait [#allocation3], 256  }
 0x247   :  { %1841 = vsyncadd [#allocation3], 4294967040 }
 0x248   :  { %1703 = vsyncpa [#allocation3], 1 }

</bundles_post_ra>
